<compile_context>
chip_gen: v5e
topology: v5e:2x2
jax: 0.10.0
libtpu: 0.0.40
codegen_flags: <defaults>
</compile_context>

<pallas_src>
import functools

import jax
import jax.numpy as jnp
from jax.experimental import pallas as pl
from jax.experimental.pallas import tpu as pltpu

# Logical dims; hidden/output dims padded to lane multiples of 128.
DIMS = (784, 400, 200, 100, 10)
IN_DIM = DIMS[0]                       # kept at 784 (full-dim block, no pad)
H1_P, H2_P, H3_P, OUT_P = 512, 256, 128, 128


def _base_batch_tile():
    """128 rows on older (128x128 MXU) chips, 256 on v6e/v7x."""
    try:
        kind = jax.devices()[0].device_kind.lower()
    except Exception:  # pragma: no cover
        kind = ""
    if any(t in kind for t in ("v2", "v3", "v4", "v5")):
        return 128
    return 256


def _pad_to(a, shape):
    return jnp.pad(a, [(0, t - s) for s, t in zip(a.shape, shape)])


def mlp_kernel(x_ref,
               w1_ref, b1_ref,
               w2_ref, b2_ref,
               w3_ref, b3_ref,
               w4_ref, b4_ref,
               o_ref):
    # x arrives as f32; cast to bf16 in-register (VPU, hidden under MXU work).
    # All matmuls accumulate in f32 on the MXU; bias add / ReLU stay f32.
    x = x_ref[...].astype(jnp.bfloat16)

    h = jnp.dot(x, w1_ref[...], preferred_element_type=jnp.float32)
    h = jnp.maximum(h + b1_ref[...], 0.0)

    h = jnp.dot(h.astype(jnp.bfloat16), w2_ref[...],
                preferred_element_type=jnp.float32)
    h = jnp.maximum(h + b2_ref[...], 0.0)

    h = jnp.dot(h.astype(jnp.bfloat16), w3_ref[...],
                preferred_element_type=jnp.float32)
    h = jnp.maximum(h + b3_ref[...], 0.0)

    h = jnp.dot(h.astype(jnp.bfloat16), w4_ref[...],
                preferred_element_type=jnp.float32)
    o_ref[...] = (h + b4_ref[...]).astype(o_ref.dtype)


@functools.partial(jax.jit, static_argnames=("tb",))
def _classifier_forward_impl(x, params, tb):
    (w1, b1), (w2, b2), (w3, b3), (w4, b4) = params
    B = x.shape[0]

    # Pad batch up to a multiple of the tile (no-op when already aligned).
    B_pad = pl.cdiv(B, tb) * tb
    xp = _pad_to(x, (B_pad, IN_DIM)).astype(jnp.float32)

    # Weights: pad only the output-feature dim to a lane multiple; bf16 for
    # full-rate MXU. Biases stay f32.
    w1p = _pad_to(w1, (IN_DIM, H1_P)).astype(jnp.bfloat16)
    w2p = _pad_to(w2, (H1_P, H2_P)).astype(jnp.bfloat16)
    w3p = _pad_to(w3, (H2_P, H3_P)).astype(jnp.bfloat16)
    w4p = _pad_to(w4, (H3_P, OUT_P)).astype(jnp.bfloat16)
    b1p = _pad_to(b1, (1, H1_P)).astype(jnp.float32)
    b2p = _pad_to(b2, (1, H2_P)).astype(jnp.float32)
    b3p = _pad_to(b3, (1, H3_P)).astype(jnp.float32)
    b4p = _pad_to(b4, (1, OUT_P)).astype(jnp.float32)

    grid = (B_pad // tb,)

    def const_spec(shape):
        # Whole array resident in VMEM, never re-fetched across grid steps.
        return pl.BlockSpec(shape, lambda i: (0, 0))

    flops = 2 * B_pad * (IN_DIM * H1_P + H1_P * H2_P + H2_P * H3_P + H3_P * OUT_P)
    bytes_accessed = (
        xp.size * 4
        + (w1p.size + w2p.size + w3p.size + w4p.size) * 2
        + (b1p.size + b2p.size + b3p.size + b4p.size) * 4
        + B_pad * OUT_P * 4
    )

    out = pl.pallas_call(
        mlp_kernel,
        out_shape=jax.ShapeDtypeStruct((B_pad, OUT_P), jnp.float32),
        grid=grid,
        in_specs=[
            # x tile: full 784 lane dim (== array dim), batch pipelined.
            pl.BlockSpec((tb, IN_DIM), lambda i: (i, 0)),
            const_spec((IN_DIM, H1_P)), const_spec((1, H1_P)),
            const_spec((H1_P, H2_P)), const_spec((1, H2_P)),
            const_spec((H2_P, H3_P)), const_spec((1, H3_P)),
            const_spec((H3_P, OUT_P)), const_spec((1, OUT_P)),
        ],
        out_specs=pl.BlockSpec((tb, OUT_P), lambda i: (i, 0)),
        compiler_params=pltpu.CompilerParams(
            dimension_semantics=("parallel",)),
        cost_estimate=pl.CostEstimate(
            flops=flops, transcendentals=0, bytes_accessed=bytes_accessed),
    )(xp, w1p, b1p, w2p, b2p, w3p, b3p, w4p, b4p)

    return out[:B, :DIMS[-1]]


def classifier_forward(x, params, tb=None):
    """x: (B, 784) float32; params: list of ((in,out) W, (1,out) b) f32."""
    if tb is None:
        base = _base_batch_tile()
        # Small batches: shrink the tile (multiple of 8) to avoid large pads.
        tb = min(base, max(8, ((x.shape[0] + 7) // 8) * 8))
    return _classifier_forward_impl(x, tuple(params), tb)


def init_params(key):
    """Deterministic init matching nn.Linear shapes.

    PyTorch nn.Linear(in, out) stores weight (out, in); we store the
    transpose (in, out) so the kernel computes x @ W + b == x @ weight.T + b.
    """
    params = []
    for i in range(4):
        fan_in, fan_out = DIMS[i], DIMS[i + 1]
        key, kw, kb = jax.random.split(key, 3)
        bound = 1.0 / jnp.sqrt(fan_in)
        w = jax.random.uniform(kw, (fan_in, fan_out), jnp.float32, -bound, bound)
        b = jax.random.uniform(kb, (1, fan_out), jnp.float32, -bound, bound)
        params.append((w, b))
    return params


def reference_forward_f32(x, params):
    h = x
    for i, (w, b) in enumerate(params):
        h = h @ w + b
        if i < 3:
            h = jnp.maximum(h, 0.0)
    return h


def reference_forward_bf16(x, params):
    """Mirrors the kernel's precision: bf16 matmul inputs, f32 accumulation."""
    h = x.astype(jnp.bfloat16)
    for i, (w, b) in enumerate(params):
        h = jnp.dot(h, w.astype(jnp.bfloat16),
                    preferred_element_type=jnp.float32) + b
        if i < 3:
            h = jnp.maximum(h, 0.0).astype(jnp.bfloat16)
    return h


if __name__ == "__main__":
    key = jax.random.PRNGKey(0)
    kx, kp = jax.random.split(key)

    B = 8  # small batch (8-row tile, single grid step)
    x = jax.random.normal(kx, (B, 784), dtype=jnp.float32)
    params = init_params(kp)

    out = classifier_forward(x, params)
    out = jax.block_until_ready(out)
    assert out.shape == (B, 10), out.shape

    # Primary check: reference with the same bf16-input / f32-accum precision.
    ref_bf16 = reference_forward_bf16(x, params)
    assert jnp.allclose(out, ref_bf16, atol=2e-3, rtol=2e-3), (
        float(jnp.max(jnp.abs(out - ref_bf16))))

    # Sanity check vs. the full-f32 module semantics (loose tolerance for
    # bf16 matmul inputs).
    ref_f32 = reference_forward_f32(x, params)
    assert jnp.allclose(out, ref_f32, atol=1e-1, rtol=1e-1), (
        float(jnp.max(jnp.abs(out - ref_f32))))

    # Also exercise a multi-tile batch path (padded, grid > 1 on real tiles).
    B2 = 300
    x2 = jax.random.normal(kx, (B2, 784), dtype=jnp.float32)
    out2 = jax.block_until_ready(classifier_forward(x2, params))
    assert out2.shape == (B2, 10)
    assert jnp.allclose(out2, reference_forward_bf16(x2, params),
                        atol=2e-3, rtol=2e-3)

    print("KERNEL_OK")
</pallas_src>

<mosaic_0001>
module attributes {stable_mosaic.version = 11 : i64} {
  func.func @mlp_kernel(%arg0: i32, %arg1: memref<8x784xf32, #tpu.memory_space<vmem>>, %arg2: memref<784x512xbf16, #tpu.memory_space<vmem>>, %arg3: memref<1x512xf32, #tpu.memory_space<vmem>>, %arg4: memref<512x256xbf16, #tpu.memory_space<vmem>>, %arg5: memref<1x256xf32, #tpu.memory_space<vmem>>, %arg6: memref<256x128xbf16, #tpu.memory_space<vmem>>, %arg7: memref<1x128xf32, #tpu.memory_space<vmem>>, %arg8: memref<128x128xbf16, #tpu.memory_space<vmem>>, %arg9: memref<1x128xf32, #tpu.memory_space<vmem>>, %arg10: memref<8x128xf32, #tpu.memory_space<vmem>>) attributes {dimension_semantics = [#tpu.dimension_semantics<parallel>], iteration_bounds = array<i64: 1>, scalar_prefetch = 0 : i64, scratch_operands = 0 : i64, tpu.core_type = #tpu.core_type<tc>, window_params = [{transform_indices = @transform_0, window_bounds = array<i64: 8, 784>}, {pipeline_mode = #tpu.pipeline_mode<synchronous>, transform_indices = @transform_1, window_bounds = array<i64: 784, 512>}, {pipeline_mode = #tpu.pipeline_mode<synchronous>, transform_indices = @transform_2, window_bounds = array<i64: 1, 512>}, {pipeline_mode = #tpu.pipeline_mode<synchronous>, transform_indices = @transform_3, window_bounds = array<i64: 512, 256>}, {pipeline_mode = #tpu.pipeline_mode<synchronous>, transform_indices = @transform_4, window_bounds = array<i64: 1, 256>}, {pipeline_mode = #tpu.pipeline_mode<synchronous>, transform_indices = @transform_5, window_bounds = array<i64: 256, 128>}, {pipeline_mode = #tpu.pipeline_mode<synchronous>, transform_indices = @transform_6, window_bounds = array<i64: 1, 128>}, {pipeline_mode = #tpu.pipeline_mode<synchronous>, transform_indices = @transform_7, window_bounds = array<i64: 128, 128>}, {pipeline_mode = #tpu.pipeline_mode<synchronous>, transform_indices = @transform_8, window_bounds = array<i64: 1, 128>}, {transform_indices = @transform_9, window_bounds = array<i64: 8, 128>}]} {
    %c0 = arith.constant 0 : index
    %c0_0 = arith.constant 0 : index
    %0 = vector.load %arg1[%c0, %c0_0] : memref<8x784xf32, #tpu.memory_space<vmem>>, vector<8x784xf32>
    %1 = arith.truncf %0 : vector<8x784xf32> to vector<8x784xbf16>
    %c0_1 = arith.constant 0 : index
    %c0_2 = arith.constant 0 : index
    %2 = vector.load %arg2[%c0_1, %c0_2] : memref<784x512xbf16, #tpu.memory_space<vmem>>, vector<784x512xbf16>
    %cst = arith.constant dense<0.000000e+00> : vector<8x512xf32>
    %3 = tpu.matmul %1, %2, %cst {dimension_numbers = #tpu.dot_dimension_numbers<[1], [0], [0], [1], [0, 0, 1, 1], [], []>} : vector<8x784xbf16>, vector<784x512xbf16>, vector<8x512xf32> -> vector<8x512xf32>
    %c0_3 = arith.constant 0 : index
    %c0_4 = arith.constant 0 : index
    %4 = vector.load %arg3[%c0_3, %c0_4] : memref<1x512xf32, #tpu.memory_space<vmem>>, vector<1x512xf32>
    %5 = vector.broadcast %4 : vector<1x512xf32> to vector<8x512xf32>
    %6 = arith.addf %3, %5 : vector<8x512xf32>
    %cst_5 = arith.constant 0.000000e+00 : f32
    %7 = vector.broadcast %cst_5 : f32 to vector<8x512xf32>
    %8 = arith.maximumf %6, %7 : vector<8x512xf32>
    %9 = arith.truncf %8 : vector<8x512xf32> to vector<8x512xbf16>
    %c0_6 = arith.constant 0 : index
    %c0_7 = arith.constant 0 : index
    %10 = vector.load %arg4[%c0_6, %c0_7] : memref<512x256xbf16, #tpu.memory_space<vmem>>, vector<512x256xbf16>
    %cst_8 = arith.constant dense<0.000000e+00> : vector<8x256xf32>
    %11 = tpu.matmul %9, %10, %cst_8 {dimension_numbers = #tpu.dot_dimension_numbers<[1], [0], [0], [1], [0, 0, 1, 1], [], []>} : vector<8x512xbf16>, vector<512x256xbf16>, vector<8x256xf32> -> vector<8x256xf32>
    %c0_9 = arith.constant 0 : index
    %c0_10 = arith.constant 0 : index
    %12 = vector.load %arg5[%c0_9, %c0_10] : memref<1x256xf32, #tpu.memory_space<vmem>>, vector<1x256xf32>
    %13 = vector.broadcast %12 : vector<1x256xf32> to vector<8x256xf32>
    %14 = arith.addf %11, %13 : vector<8x256xf32>
    %cst_11 = arith.constant 0.000000e+00 : f32
    %15 = vector.broadcast %cst_11 : f32 to vector<8x256xf32>
    %16 = arith.maximumf %14, %15 : vector<8x256xf32>
    %17 = arith.truncf %16 : vector<8x256xf32> to vector<8x256xbf16>
    %c0_12 = arith.constant 0 : index
    %c0_13 = arith.constant 0 : index
    %18 = vector.load %arg6[%c0_12, %c0_13] : memref<256x128xbf16, #tpu.memory_space<vmem>>, vector<256x128xbf16>
    %cst_14 = arith.constant dense<0.000000e+00> : vector<8x128xf32>
    %19 = tpu.matmul %17, %18, %cst_14 {dimension_numbers = #tpu.dot_dimension_numbers<[1], [0], [0], [1], [0, 0, 1, 1], [], []>} : vector<8x256xbf16>, vector<256x128xbf16>, vector<8x128xf32> -> vector<8x128xf32>
    %c0_15 = arith.constant 0 : index
    %c0_16 = arith.constant 0 : index
    %20 = vector.load %arg7[%c0_15, %c0_16] : memref<1x128xf32, #tpu.memory_space<vmem>>, vector<1x128xf32>
    %21 = vector.broadcast %20 : vector<1x128xf32> to vector<8x128xf32>
    %22 = arith.addf %19, %21 : vector<8x128xf32>
    %cst_17 = arith.constant 0.000000e+00 : f32
    %23 = vector.broadcast %cst_17 : f32 to vector<8x128xf32>
    %24 = arith.maximumf %22, %23 : vector<8x128xf32>
    %25 = arith.truncf %24 : vector<8x128xf32> to vector<8x128xbf16>
    %c0_18 = arith.constant 0 : index
    %c0_19 = arith.constant 0 : index
    %26 = vector.load %arg8[%c0_18, %c0_19] : memref<128x128xbf16, #tpu.memory_space<vmem>>, vector<128x128xbf16>
    %cst_20 = arith.constant dense<0.000000e+00> : vector<8x128xf32>
    %27 = tpu.matmul %25, %26, %cst_20 {dimension_numbers = #tpu.dot_dimension_numbers<[1], [0], [0], [1], [0, 0, 1, 1], [], []>} : vector<8x128xbf16>, vector<128x128xbf16>, vector<8x128xf32> -> vector<8x128xf32>
    %c0_21 = arith.constant 0 : index
    %c0_22 = arith.constant 0 : index
    %28 = vector.load %arg9[%c0_21, %c0_22] : memref<1x128xf32, #tpu.memory_space<vmem>>, vector<1x128xf32>
    %29 = vector.broadcast %28 : vector<1x128xf32> to vector<8x128xf32>
    %30 = arith.addf %27, %29 : vector<8x128xf32>
    %c0_23 = arith.constant 0 : index
    %c0_24 = arith.constant 0 : index
    %31 = vector.load %arg10[%c0_23, %c0_24] : memref<8x128xf32, #tpu.memory_space<vmem>>, vector<8x128xf32>
    tpu.vector_store %arg10[%c0_23, %c0_24], %30 {strides = array<i32>} : memref<8x128xf32, #tpu.memory_space<vmem>>, vector<8x128xf32>,
    return
  }
  func.func @transform_0(%arg0: i32) -> (i32, i32) {
    %c0_i32 = arith.constant 0 : i32
    %c0_i32_0 = arith.constant 0 : i32
    return %arg0, %c0_i32 : i32, i32
  }
  func.func @transform_1(%arg0: i32) -> (i32, i32) {
    %c0_i32 = arith.constant 0 : i32
    %c0_i32_0 = arith.constant 0 : i32
    %c0_i32_1 = arith.constant 0 : i32
    return %c0_i32, %c0_i32_0 : i32, i32
  }
  func.func @transform_2(%arg0: i32) -> (i32, i32) {
    %c0_i32 = arith.constant 0 : i32
    %c0_i32_0 = arith.constant 0 : i32
    %c0_i32_1 = arith.constant 0 : i32
    return %c0_i32, %c0_i32_0 : i32, i32
  }
  func.func @transform_3(%arg0: i32) -> (i32, i32) {
    %c0_i32 = arith.constant 0 : i32
    %c0_i32_0 = arith.constant 0 : i32
    %c0_i32_1 = arith.constant 0 : i32
    return %c0_i32, %c0_i32_0 : i32, i32
  }
  func.func @transform_4(%arg0: i32) -> (i32, i32) {
    %c0_i32 = arith.constant 0 : i32
    %c0_i32_0 = arith.constant 0 : i32
    %c0_i32_1 = arith.constant 0 : i32
    return %c0_i32, %c0_i32_0 : i32, i32
  }
  func.func @transform_5(%arg0: i32) -> (i32, i32) {
    %c0_i32 = arith.constant 0 : i32
    %c0_i32_0 = arith.constant 0 : i32
    %c0_i32_1 = arith.constant 0 : i32
    return %c0_i32, %c0_i32_0 : i32, i32
  }
  func.func @transform_6(%arg0: i32) -> (i32, i32) {
    %c0_i32 = arith.constant 0 : i32
    %c0_i32_0 = arith.constant 0 : i32
    %c0_i32_1 = arith.constant 0 : i32
    return %c0_i32, %c0_i32_0 : i32, i32
  }
  func.func @transform_7(%arg0: i32) -> (i32, i32) {
    %c0_i32 = arith.constant 0 : i32
    %c0_i32_0 = arith.constant 0 : i32
    %c0_i32_1 = arith.constant 0 : i32
    return %c0_i32, %c0_i32_0 : i32, i32
  }
  func.func @transform_8(%arg0: i32) -> (i32, i32) {
    %c0_i32 = arith.constant 0 : i32
    %c0_i32_0 = arith.constant 0 : i32
    %c0_i32_1 = arith.constant 0 : i32
    return %c0_i32, %c0_i32_0 : i32, i32
  }
  func.func @transform_9(%arg0: i32) -> (i32, i32) {
    %c0_i32 = arith.constant 0 : i32
    %c0_i32_0 = arith.constant 0 : i32
    return %arg0, %c0_i32 : i32, i32
  }
}

</mosaic_0001>

<bundles_post_ra>
// kernel: _classifier_forward_impl.1
= control target key start
LH: loop header
LB: loop body
LE: loop exit
PB: predicated region body
PF: predicated region fallthrough
CT: control target
= control target key end

     0   :  { %vm1234_vm0 = vcmask 130048   ;;  %s5609_s0 = inlined_call_operand.vmem [shape: f32[8,784], index: 0, kind: input, shape index: {}]   ;;  %s5610_s1 = inlined_call_operand.vmem [shape: bf16[784,512], index: 1, kind: input, shape index: {}]   ;;  %s5611_s2 = inlined_call_operand.vmem [shape: f32[1,512], index: 2, kind: input, shape index: {}]   ;;  %s5612_s3 = inlined_call_operand.vmem [shape: bf16[512,256], index: 3, kind: input, shape index: {}]   ;;  %s5613_s4 = inlined_call_operand.vmem [shape: f32[1,256], index: 4, kind: input, shape index: {}]   ;;  %s5614_s5 = inlined_call_operand.vmem [shape: bf16[256,128], index: 5, kind: input, shape index: {}]   ;;  %s5615_s6 = inlined_call_operand.vmem [shape: f32[1,128], index: 6, kind: input, shape index: {}]   ;;  %s5616_s7 = inlined_call_operand.vmem [shape: bf16[128,128], index: 7, kind: input, shape index: {}]   ;;  %s5617_s8 = inlined_call_operand.vmem [shape: f32[1,128], index: 8, kind: input, shape index: {}]   ;;  %s5618_s9 = inlined_call_operand.hbm [shape: f32[8,128], index: 9, kind: output, shape index: {}]  }
   0x1   :  { %v2480_v0 = vld [vmem:[%s5610_s1 + $0xe0] sm:$0xf]  ;;  %v3536_v1 = vld [vmem:[%s5610_s1 + $0xec] sm:$0xf0] }
   0x2   :  { %v2608_v2 = vld [vmem:[%s5610_s1 + $0x1e0] sm:$0xf]  ;;  %v2481_v3 = vor.u32 %v3536_v1, %v2480_v0  ;;  %v3568_v4 = vld [vmem:[%s5610_s1 + $0x1ec] sm:$0xf0] }
   0x3   :  { %v2736_v5 = vld [vmem:[%s5610_s1 + $0x2e0] sm:$0xf]  ;;  %v3600_v6 = vld [vmem:[%s5610_s1 + $0x2ec] sm:$0xf0]  ;;  %v2609_v7 = vor.u32 %v3568_v4, %v2608_v2 }
   0x4   :  { %v2737_v8 = vor.u32 %v3600_v6, %v2736_v5  ;;  %v2864_v9 = vld [vmem:[%s5610_s1 + $0x3e0] sm:$0xf]  ;;  %v3632_v10 = vld [vmem:[%s5610_s1 + $0x3ec] sm:$0xf0]  ;;  %1238 = vmatpush.bf16.msra.mxu0 %v2481_v3 }
   0x5   :  { %v2464_v11 = vld [vmem:[%s5610_s1 + $0xc0] sm:$0xf]  ;;  %v2865_v12 = vor.u32 %v3632_v10, %v2864_v9  ;;  %v3532_v13 = vld [vmem:[%s5610_s1 + $0xcc] sm:$0xf0]  ;;  %1251 = vmatpush.bf16.msra.mxu1 %v2609_v7 }
   0x6   :  { %v2592_v14 = vld [vmem:[%s5610_s1 + $0x1c0] sm:$0xf]  ;;  %v3564_v15 = vld [vmem:[%s5610_s1 + $0x1cc] sm:$0xf0]  ;;  %1264 = vmatpush.bf16.msra.mxu2 %v2737_v8  ;;  %v2465_v16 = vor.u32 %v3532_v13, %v2464_v11 }
   0x7   :  { %v2593_v17 = vor.u32 %v3564_v15, %v2592_v14  ;;  %v2720_v18 = vld [vmem:[%s5610_s1 + $0x2c0] sm:$0xf]  ;;  %v3596_v19 = vld [vmem:[%s5610_s1 + $0x2cc] sm:$0xf0]  ;;  %1277 = vmatpush.bf16.msra.mxu3 %v2865_v12 }
   0x8   :  { %v2848_v20 = vld [vmem:[%s5610_s1 + $0x3c0] sm:$0xf]  ;;  %v2721_v21 = vor.u32 %v3596_v19, %v2720_v18  ;;  %v3628_v22 = vld [vmem:[%s5610_s1 + $0x3cc] sm:$0xf0]  ;;  %1239 = vmatpush.bf16.msra.mxu0 %v2465_v16 }
   0x9   :  { %v2448_v23 = vld [vmem:[%s5610_s1 + $0xa0] sm:$0xf]  ;;  %v3528_v24 = vld [vmem:[%s5610_s1 + $0xac] sm:$0xf0]  ;;  %v2849_v25 = vor.u32 %v3628_v22, %v2848_v20  ;;  %1252 = vmatpush.bf16.msra.mxu1 %v2593_v17 }
   0xa   :  { %v2576_v26 = vld [vmem:[%s5610_s1 + $0x1a0] sm:$0xf]  ;;  %v3560_v27 = vld [vmem:[%s5610_s1 + $0x1ac] sm:$0xf0]  ;;  %v2449_v29 = vor.u32 %v3528_v24, %v2448_v23  ;;  %1265 = vmatpush.bf16.msra.mxu2 %v2721_v21 }
   0xb   :  { %v2704_v28 = vld [vmem:[%s5610_s1 + $0x2a0] sm:$0xf]  ;;  %v3592_v30 = vld [vmem:[%s5610_s1 + $0x2ac] sm:$0xf0]  ;;  %v2577_v33 = vor.u32 %v3560_v27, %v2576_v26  ;;  %1278 = vmatpush.bf16.msra.mxu3 %v2849_v25 }
   0xc   :  { %v2832_v31 = vld [vmem:[%s5610_s1 + $0x3a0] sm:$0xf]  ;;  %v3624_v32 = vld [vmem:[%s5610_s1 + $0x3ac] sm:$0xf0]  ;;  %v2705_v34 = vor.u32 %v3592_v30, %v2704_v28  ;;  %1240 = vmatpush.bf16.msra.mxu0 %v2449_v29 }
   0xd   :  { %v2432_v35 = vld [vmem:[%s5610_s1 + $0x80] sm:$0xf]  ;;  %v3524_v36 = vld [vmem:[%s5610_s1 + $0x8c] sm:$0xf0]  ;;  %v2833_v38 = vor.u32 %v3624_v32, %v2832_v31  ;;  %1253 = vmatpush.bf16.msra.mxu1 %v2577_v33  ;;  %v3534_v33 = vld [vmem:[%s5610_s1 + $0xe4] sm:$0xf] }
   0xe   :  { %v2560_v37 = vld [vmem:[%s5610_s1 + $0x180] sm:$0xf]  ;;  %v3556_v39 = vld [vmem:[%s5610_s1 + $0x18c] sm:$0xf0]  ;;  %v2433_v44 = vor.u32 %v3524_v36, %v2432_v35  ;;  %1266 = vmatpush.bf16.msra.mxu2 %v2705_v34  ;;  %v2482_v34 = vld [vmem:[%s5610_s1 + $0xf0] sm:$0xf0] }
   0xf   :  { %v2688_v40 = vld [vmem:[%s5610_s1 + $0x280] sm:$0xf]  ;;  %v3588_v41 = vld [vmem:[%s5610_s1 + $0x28c] sm:$0xf0]  ;;  %v2561_v45 = vor.u32 %v3556_v39, %v2560_v37  ;;  %1279 = vmatpush.bf16.msra.mxu3 %v2833_v38 }
  0x10   :  { %v2816_v42 = vld [vmem:[%s5610_s1 + $0x380] sm:$0xf]  ;;  %v3620_v43 = vld [vmem:[%s5610_s1 + $0x38c] sm:$0xf0]  ;;  %v2689_v46 = vor.u32 %v3588_v41, %v2688_v40  ;;  %1241 = vmatpush.bf16.msra.mxu0 %v2433_v44  ;;  %v2610_v44 = vld [vmem:[%s5610_s1 + $0x1f0] sm:$0xf0] }
  0x11   :  { %v2416_v47 = vld [vmem:[%s5610_s1 + $0x60] sm:$0xf]  ;;  %v3520_v48 = vld [vmem:[%s5610_s1 + $0x6c] sm:$0xf0]  ;;  %v2817_v50 = vor.u32 %v3620_v43, %v2816_v42  ;;  %1254 = vmatpush.bf16.msra.mxu1 %v2561_v45  ;;  %v3566_v43 = vld [vmem:[%s5610_s1 + $0x1e4] sm:$0xf] }
  0x12   :  { %v2544_v49 = vld [vmem:[%s5610_s1 + $0x160] sm:$0xf]  ;;  %v3552_v51 = vld [vmem:[%s5610_s1 + $0x16c] sm:$0xf0]  ;;  %v2417_v56 = vor.u32 %v3520_v48, %v2416_v47  ;;  %1267 = vmatpush.bf16.msra.mxu2 %v2689_v46  ;;  %v37_v45 = vld [vmem:[%s5609_s0 + $0x18] sm:$0xff]  ;;  %v2485_v47 = vor.u32 %v3534_v33, %v2482_v34 }
  0x13   :  { %v2672_v52 = vld [vmem:[%s5610_s1 + $0x260] sm:$0xf]  ;;  %v3584_v53 = vld [vmem:[%s5610_s1 + $0x26c] sm:$0xf0]  ;;  %v2545_v57 = vor.u32 %v3552_v51, %v2544_v49  ;;  %1280 = vmatpush.bf16.msra.mxu3 %v2817_v50 }
  0x14   :  { %v2800_v54 = vld [vmem:[%s5610_s1 + $0x360] sm:$0xf]  ;;  %v3616_v55 = vld [vmem:[%s5610_s1 + $0x36c] sm:$0xf0]  ;;  %v2673_v58 = vor.u32 %v3584_v53, %v2672_v52  ;;  %1242 = vmatpush.bf16.msra.mxu0 %v2417_v56  ;;  %v3530_v53 = vld [vmem:[%s5610_s1 + $0xc4] sm:$0xf] }
  0x15   :  { %v2400_v59 = vld [vmem:[%s5610_s1 + $0x40] sm:$0xf]  ;;  %v3516_v60 = vld [vmem:[%s5610_s1 + $0x4c] sm:$0xf0]  ;;  %v2801_v62 = vor.u32 %v3616_v55, %v2800_v54  ;;  %1255 = vmatpush.bf16.msra.mxu1 %v2545_v57  ;;  %v2466_v54 = vld [vmem:[%s5610_s1 + $0xd0] sm:$0xf0]  ;;  %v4123_v57 = vpack.c.bf16 %v37_v45, %v37_v45 }
  0x16   :  { %v2528_v61 = vld [vmem:[%s5610_s1 + $0x140] sm:$0xf]  ;;  %v3548_v63 = vld [vmem:[%s5610_s1 + $0x14c] sm:$0xf0]  ;;  %v2401_v4 = vor.u32 %v3516_v60, %v2400_v59  ;;  %1268 = vmatpush.bf16.msra.mxu2 %v2673_v58  ;;  %v35_v58 = vld [vmem:[%s5609_s0 + $0x8] sm:$0xff]  ;;  %v2613_v59 = vor.u32 %v3566_v43, %v2610_v44 }
  0x17   :  { %v2656_v0 = vld [vmem:[%s5610_s1 + $0x240] sm:$0xf]  ;;  %v3580_v1 = vld [vmem:[%s5610_s1 + $0x24c] sm:$0xf0]  ;;  %v2529_v5 = vor.u32 %v3548_v63, %v2528_v61  ;;  %1281 = vmatpush.bf16.msra.mxu3 %v2801_v62  ;;  %v3562_v61 = vld [vmem:[%s5610_s1 + $0x1c4] sm:$0xf] }
  0x18   :  { %v2784_v2 = vld [vmem:[%s5610_s1 + $0x340] sm:$0xf]  ;;  %v3612_v3 = vld [vmem:[%s5610_s1 + $0x34c] sm:$0xf0]  ;;  %v2657_v6 = vor.u32 %v3580_v1, %v2656_v0  ;;  %1243 = vmatpush.bf16.msra.mxu0 %v2401_v4  ;;  %v2594_v62 = vld [vmem:[%s5610_s1 + $0x1d0] sm:$0xf0]  ;;  %v2469_v0 = vor.u32 %v3530_v53, %v2466_v54 }
  0x19   :  { %v2384_v7 = vld [vmem:[%s5610_s1 + $0x20] sm:$0xf]  ;;  %v3512_v8 = vld [vmem:[%s5610_s1 + $0x2c] sm:$0xf0]  ;;  %v2785_v10 = vor.u32 %v3612_v3, %v2784_v2  ;;  %1256 = vmatpush.bf16.msra.mxu1 %v2529_v5  ;;  %v3526_v5 = vld [vmem:[%s5610_s1 + $0xa4] sm:$0xf] }
  0x1a   :  { %v2512_v9 = vld [vmem:[%s5610_s1 + $0x120] sm:$0xf]  ;;  %v3544_v11 = vld [vmem:[%s5610_s1 + $0x12c] sm:$0xf0]  ;;  %v2385_v16 = vor.u32 %v3512_v8, %v2384_v7  ;;  %1269 = vmatpush.bf16.msra.mxu2 %v2657_v6  ;;  %v2450_v6 = vld [vmem:[%s5610_s1 + $0xb0] sm:$0xf0]  ;;  %v4154_v7 = vpack.c.bf16 %v35_v58, %v35_v58  ;;  %v2597_v8 = vor.u32 %v3562_v61, %v2594_v62 }
  0x1b   :  { %v2640_v12 = vld [vmem:[%s5610_s1 + $0x220] sm:$0xf]  ;;  %v3576_v13 = vld [vmem:[%s5610_s1 + $0x22c] sm:$0xf0]  ;;  %v2513_v20 = vor.u32 %v3544_v11, %v2512_v9  ;;  %1282 = vmatpush.bf16.msra.mxu3 %v2785_v10  ;;  %v3558_v10 = vld [vmem:[%s5610_s1 + $0x1a4] sm:$0xf] }
  0x1c   :  { %v2768_v14 = vld [vmem:[%s5610_s1 + $0x320] sm:$0xf]  ;;  %v3608_v15 = vld [vmem:[%s5610_s1 + $0x32c] sm:$0xf0]  ;;  %v2641_v21 = vor.u32 %v3576_v13, %v2640_v12  ;;  %1244 = vmatpush.bf16.msra.mxu0 %v2385_v16  ;;  %v2578_v11 = vld [vmem:[%s5610_s1 + $0x1b0] sm:$0xf0]  ;;  %v2453_v13 = vor.u32 %v3526_v5, %v2450_v6 }
  0x1d   :  { %v2368_v17 = vld [vmem:[%s5610_s1] sm:$0xf]  ;;  %v3508_v18 = vld [vmem:[%s5610_s1 + $0xc] sm:$0xf0]  ;;  %v2769_v25 = vor.u32 %v3608_v15, %v2768_v14  ;;  %1257 = vmatpush.bf16.msra.mxu1 %v2513_v20  ;;  %v2581_v20 = vor.u32 %v3558_v10, %v2578_v11  ;;  %v3514_v43 = vld [vmem:[%s5610_s1 + $0x44] sm:$0xf] }
  0x1e   :  { %v2496_v19 = vld [vmem:[%s5610_s1 + $0x100] sm:$0xf]  ;;  %v3540_v22 = vld [vmem:[%s5610_s1 + $0x10c] sm:$0xf0]  ;;  %v2369_v32 = vor.u32 %v3508_v18, %v2368_v17  ;;  %1270 = vmatpush.bf16.msra.mxu2 %v2641_v21  ;;  %v3522_v18 = vld [vmem:[%s5610_s1 + $0x84] sm:$0xf] }
  0x1f   :  { %v2624_v23 = vld [vmem:[%s5610_s1 + $0x200] sm:$0xf]  ;;  %v3572_v24 = vld [vmem:[%s5610_s1 + $0x20c] sm:$0xf0]  ;;  %v2497_v36 = vor.u32 %v3540_v22, %v2496_v19  ;;  %1283 = vmatpush.bf16.msra.mxu3 %v2769_v25  ;;  %v2434_v19 = vld [vmem:[%s5610_s1 + $0x90] sm:$0xf0] }
  0x20   :  { %v2752_v26 = vld [vmem:[%s5610_s1 + $0x300] sm:$0xf]  ;;  %v3604_v27 = vld [vmem:[%s5610_s1 + $0x30c] sm:$0xf0]  ;;  %v2625_v37 = vor.u32 %v3572_v24, %v2624_v23  ;;  %1245 = vmatpush.bf16.msra.mxu0 %v2369_v32  ;;  %v3554_v22 = vld [vmem:[%s5610_s1 + $0x184] sm:$0xf]  ;;  %v2437_v25 = vor.u32 %v3522_v18, %v2434_v19 }
  0x21   :  { %v2992_v28 = vld [vmem:[%s5610_s1 + $0x4e0] sm:$0xf]  ;;  %v3664_v29 = vld [vmem:[%s5610_s1 + $0x4ec] sm:$0xf0]  ;;  %v2753_v41 = vor.u32 %v3604_v27, %v2752_v26  ;;  %1258 = vmatpush.bf16.msra.mxu1 %v2497_v36  ;;  %v2562_v23 = vld [vmem:[%s5610_s1 + $0x190] sm:$0xf0] }
  0x22   :  { %v3120_v30 = vld [vmem:[%s5610_s1 + $0x5e0] sm:$0xf]  ;;  %v3696_v31 = vld [vmem:[%s5610_s1 + $0x5ec] sm:$0xf0]  ;;  %v2993_v42 = vor.u32 %v3664_v29, %v2992_v28  ;;  %1271 = vmatpush.bf16.msra.mxu2 %v2625_v37  ;;  %v2565_v33 = vor.u32 %v3554_v22, %v2562_v23  ;;  %v2546_v36 = vld [vmem:[%s5610_s1 + $0x170] sm:$0xf0] }
  0x23   :  { %v36_v35 = vld [vmem:[%s5609_s0 + $0x10] sm:$0xff]  ;;  %v3136_v38 = vld [vmem:[%s5610_s1 + $0x600] sm:$0xf]  ;;  %v3121_v46 = vor.u32 %v3696_v31, %v3120_v30  ;;  %1284 = vmatpush.bf16.msra.mxu3 %v2753_v41  ;;  %v3518_v30 = vld [vmem:[%s5610_s1 + $0x64] sm:$0xf] }
  0x24   :  { %v3700_v39 = vld [vmem:[%s5610_s1 + $0x60c] sm:$0xf0]  ;;  %v34_v40 = vld [vmem:[%s5609_s0] sm:$0xff]  ;;  %v4110_v51 = vpack.c.bf16 %v36_v35, %v36_v35  ;;  %1290 = vmatpush.bf16.msrb.mxu0 %v2993_v42  ;;  %1259 = vmatmul.bf16.vlgmr.msra.gmra.mxu1 %v4154_v7  ;;  %v2418_v31 = vld [vmem:[%s5610_s1 + $0x70] sm:$0xf0] }
  0x25   :  { %v2976_v48 = vld [vmem:[%s5610_s1 + $0x4c0] sm:$0xf]  ;;  %v3660_v49 = vld [vmem:[%s5610_s1 + $0x4cc] sm:$0xf0]  ;;  %v4121_v55 = vpack.c.bf16 %v34_v40, %v34_v40  ;;  %v3137_v56 = vor.u32 %v3700_v39, %v3136_v38  ;;  %1303 = vmatpush.bf16.msrb.mxu1 %v3121_v46  ;;  %v3550_v35 = vld [vmem:[%s5610_s1 + $0x164] sm:$0xf]  ;;  %v2421_v38 = vor.u32 %v3518_v30, %v2418_v31 }
  0x26   :  { %v3104_v50 = vld [vmem:[%s5610_s1 + $0x5c0] sm:$0xf]  ;;  %v3692_v52 = vld [vmem:[%s5610_s1 + $0x5cc] sm:$0xf0]  ;;  %v2977_v60 = vor.u32 %v3660_v49, %v2976_v48  ;;  %1272 = vmatmul.bf16.vlgmr.msra.gmra.mxu2 %v4110_v51  ;;  %1285 = vmatmul.bf16.vlgmr.msra.gmra.mxu3 %v4123_v57  ;;  %v2402_v44 = vld [vmem:[%s5610_s1 + $0x50] sm:$0xf0]  ;;  %v2549_v46 = vor.u32 %v3550_v35, %v2546_v36 }
  0x27   :  { %1329 = vmatpush.bf16.msrb.mxu3 %v2485_v47  ;;  %v3105_v63 = vor.u32 %v3692_v52, %v3104_v50  ;;  %v2960_v1 = vld [vmem:[%s5610_s1 + $0x4a0] sm:$0xf]  ;;  %v3656_v2 = vld [vmem:[%s5610_s1 + $0x4ac] sm:$0xf0]  ;;  %1246 = vmatmul.bf16.vlgmr.msra.gmra.mxu0 %v4121_v55  ;;  %v3546_v48 = vld [vmem:[%s5610_s1 + $0x144] sm:$0xf]  ;;  %v2405_v52 = vor.u32 %v3514_v43, %v2402_v44 }
  0x28   :  { %v3088_v3 = vld [vmem:[%s5610_s1 + $0x5a0] sm:$0xf]  ;;  %v3688_v4 = vld [vmem:[%s5610_s1 + $0x5ac] sm:$0xf0]  ;;  %1323 = vmatpush.bf16.msrb.mxu2 %v3137_v56  ;;  %1291 = vmatpush.bf16.msrb.mxu0 %v2977_v60  ;;  %v2961_v9 = vor.u32 %v3656_v2, %v2960_v1  ;;  %v2530_v49 = vld [vmem:[%s5610_s1 + $0x150] sm:$0xf0] }
  0x29   :  { %1304 = vmatpush.bf16.msrb.mxu1 %v3105_v63  ;;  %v3089_v12 = vor.u32 %v3688_v4, %v3088_v3  ;;  %v2944_v14 = vld [vmem:[%s5610_s1 + $0x480] sm:$0xf]  ;;  %v3652_v15 = vld [vmem:[%s5610_s1 + $0x48c] sm:$0xf0]  ;;  %v2386_v60 = vld [vmem:[%s5610_s1 + $0x30] sm:$0xf0]  ;;  %v2533_v61 = vor.u32 %v3546_v48, %v2530_v49 }
  0x2a   :  { %v3072_v16 = vld [vmem:[%s5610_s1 + $0x580] sm:$0xf]  ;;  %v3684_v17 = vld [vmem:[%s5610_s1 + $0x58c] sm:$0xf0]  ;;  %v2945_v21 = vor.u32 %v3652_v15, %v2944_v14  ;;  %v3542_v63 = vld [vmem:[%s5610_s1 + $0x124] sm:$0xf] }
  0x2b   :  { %1330 = vmatpush.bf16.msrb.mxu3 %v2469_v0  ;;  %v3073_v24 = vor.u32 %v3684_v17, %v3072_v16  ;;  %v2928_v26 = vld [vmem:[%s5610_s1 + $0x460] sm:$0xf]  ;;  %v3648_v27 = vld [vmem:[%s5610_s1 + $0x46c] sm:$0xf0]  ;;  %v2514_v0 = vld [vmem:[%s5610_s1 + $0x130] sm:$0xf0] }
  0x2c   :  { %1342 = vmatpush.bf16.msra.mxu2 %v2613_v59  ;;  %1292 = vmatpush.bf16.msrb.mxu0 %v2961_v9  ;;  %v3056_v28 = vld [vmem:[%s5610_s1 + $0x560] sm:$0xf]  ;;  %v3680_v29 = vld [vmem:[%s5610_s1 + $0x56c] sm:$0xf0]  ;;  %v2929_v34 = vor.u32 %v3648_v27, %v2928_v26  ;;  %v3510_v59 = vld [vmem:[%s5610_s1 + $0x24] sm:$0xf]  ;;  %v2517_v14 = vor.u32 %v3542_v63, %v2514_v0 }
  0x2d   :  { %1305 = vmatpush.bf16.msrb.mxu1 %v3089_v12  ;;  %v40_v32 = vld [vmem:[%s5609_s0 + $0x30] sm:$0xff]  ;;  %v3057_v37 = vor.u32 %v3680_v29, %v3056_v28  ;;  %v2912_v39 = vld [vmem:[%s5610_s1 + $0x440] sm:$0xf]  ;;  %v2389_v3 = vor.u32 %v3510_v59, %v2386_v60  ;;  %v3598_v10 = vld [vmem:[%s5610_s1 + $0x2e4] sm:$0xf] }
  0x2e   :  { %v3644_v40 = vld [vmem:[%s5610_s1 + $0x44c] sm:$0xf0]  ;;  %v3040_v41 = vld [vmem:[%s5610_s1 + $0x540] sm:$0xf]  ;;  %v4233_v45 = vpack.c.bf16 %v40_v32, %v40_v32  ;;  %v2370_v9 = vld [vmem:[%s5610_s1 + $0x10] sm:$0xf0] }
  0x2f   :  { %1331 = vmatpush.bf16.msrb.mxu3 %v2453_v13  ;;  %v3676_v42 = vld [vmem:[%s5610_s1 + $0x54c] sm:$0xf0]  ;;  %v2913_v47 = vor.u32 %v3644_v40, %v2912_v39  ;;  %v2896_v53 = vld [vmem:[%s5610_s1 + $0x420] sm:$0xf]  ;;  %v2738_v11 = vld [vmem:[%s5610_s1 + $0x2f0] sm:$0xf0] }
  0x30   :  { %1343 = vmatpush.bf16.msra.mxu2 %v2597_v8  ;;  %1293 = vmatpush.bf16.msrb.mxu0 %v2945_v21  ;;  %v3041_v50 = vor.u32 %v3676_v42, %v3040_v41  ;;  %v3640_v54 = vld [vmem:[%s5610_s1 + $0x42c] sm:$0xf0]  ;;  %v3024_v56 = vld [vmem:[%s5610_s1 + $0x520] sm:$0xf]  ;;  %v3506_v8 = vld [vmem:[%s5610_s1 + $0x4] sm:$0xf] }
  0x31   :  { %1306 = vmatpush.bf16.msrb.mxu1 %v3073_v24  ;;  %v3672_v58 = vld [vmem:[%s5610_s1 + $0x52c] sm:$0xf0]  ;;  %v2897_v62 = vor.u32 %v3640_v54, %v2896_v53  ;;  %v2880_v1 = vld [vmem:[%s5610_s1 + $0x400] sm:$0xf]  ;;  %v3630_v12 = vld [vmem:[%s5610_s1 + $0x3e4] sm:$0xf]  ;;  %v2741_v24 = vor.u32 %v3598_v10, %v2738_v11 }
  0x32   :  { %v3025_v2 = vor.u32 %v3672_v58, %v3024_v56  ;;  %v3636_v4 = vld [vmem:[%s5610_s1 + $0x40c] sm:$0xf0]  ;;  %v3008_v5 = vld [vmem:[%s5610_s1 + $0x500] sm:$0xf]  ;;  %v2866_v13 = vld [vmem:[%s5610_s1 + $0x3f0] sm:$0xf0] }
  0x33   :  { %1332 = vmatpush.bf16.msrb.mxu3 %v2437_v25  ;;  %v3668_v6 = vld [vmem:[%s5610_s1 + $0x50c] sm:$0xf0]  ;;  %v2881_v15 = vor.u32 %v3636_v4, %v2880_v1  ;;  %v3662_v16 = vld [vmem:[%s5610_s1 + $0x4e4] sm:$0xf]  ;;  %v2994_v17 = vld [vmem:[%s5610_s1 + $0x4f0] sm:$0xf0]  ;;  %v2869_v25 = vor.u32 %v3630_v12, %v2866_v13 }
  0x34   :  { %1344 = vmatpush.bf16.msra.mxu2 %v2581_v20  ;;  %1294 = vmatpush.bf16.msrb.mxu0 %v2929_v34  ;;  %v38_v18 = vld [vmem:[%s5609_s0 + $0x20] sm:$0xff]  ;;  %v3009_v19 = vor.u32 %v3668_v6, %v3008_v5  ;;  %v2373_v20 = vor.u32 %v3506_v8, %v2370_v9  ;;  %v2498_v22 = vld [vmem:[%s5610_s1 + $0x110] sm:$0xf0]  ;;  %v39_v23 = vld [vmem:[%s5609_s0 + $0x28] sm:$0xff]  ;;  %v2997_v29 = vor.u32 %v3662_v16, %v2994_v17 }
  0x35   :  { %1307 = vmatpush.bf16.msrb.mxu1 %v3057_v37  ;;  %v3538_v21 = vld [vmem:[%s5610_s1 + $0x104] sm:$0xf]  ;;  %v3122_v27 = vld [vmem:[%s5610_s1 + $0x5f0] sm:$0xf0]  ;;  %v4324_v30 = vpack.c.bf16 %v38_v18, %v38_v18  ;;  %v4335_v35 = vpack.c.bf16 %v39_v23, %v39_v23 }
  0x36   :  { %3150 = vmatmul.msk.bf16.vlgmr.msrb.gmra.mxu2 %vm1234_vm0, %v4233_v45  ;;  %v3694_v26 = vld [vmem:[%s5610_s1 + $0x5e4] sm:$0xf]  ;;  %v2722_v31 = vld [vmem:[%s5610_s1 + $0x2d0] sm:$0xf0]  ;;  %v2501_v34 = vor.u32 %v3538_v21, %v2498_v22 }
  0x37   :  { %1333 = vmatpush.bf16.msrb.mxu3 %v2421_v38  ;;  %v3594_v28 = vld [vmem:[%s5610_s1 + $0x2c4] sm:$0xf]  ;;  %v2978_v37 = vld [vmem:[%s5610_s1 + $0x4d0] sm:$0xf0]  ;;  %v3125_v38 = vor.u32 %v3694_v26, %v3122_v27 }
  0x38   :  { %1345 = vmatpush.bf16.msra.mxu2 %v2565_v33  ;;  %1295 = vmatpush.bf16.msrb.mxu0 %v2913_v47  ;;  %v3626_v32 = vld [vmem:[%s5610_s1 + $0x3c4] sm:$0xf]  ;;  %v2850_v33 = vld [vmem:[%s5610_s1 + $0x3d0] sm:$0xf0]  ;;  %v2725_v39 = vor.u32 %v3594_v28, %v2722_v31 }
  0x39   :  { %1308 = vmatpush.bf16.msrb.mxu1 %v3041_v50  ;;  %v3658_v36 = vld [vmem:[%s5610_s1 + $0x4c4] sm:$0xf]  ;;  %v2853_v40 = vor.u32 %v3626_v32, %v2850_v33  ;;  %v3106_v42 = vld [vmem:[%s5610_s1 + $0x5d0] sm:$0xf0] }
  0x3a   :  { %v3690_v41 = vld [vmem:[%s5610_s1 + $0x5c4] sm:$0xf]  ;;  %v2981_v44 = vor.u32 %v3658_v36, %v2978_v37  ;;  %v2834_v48 = vld [vmem:[%s5610_s1 + $0x3b0] sm:$0xf0] }
  0x3b   :  { %1334 = vmatpush.bf16.msrb.mxu3 %v2405_v52  ;;  %v3590_v43 = vld [vmem:[%s5610_s1 + $0x2a4] sm:$0xf]  ;;  %v2962_v50 = vld [vmem:[%s5610_s1 + $0x4b0] sm:$0xf0]  ;;  %v3109_v52 = vor.u32 %v3690_v41, %v3106_v42 }
  0x3c   :  { %1346 = vmatpush.bf16.msra.mxu2 %v2549_v46  ;;  %1296 = vmatpush.bf16.msrb.mxu0 %v2897_v62  ;;  %v2706_v46 = vld [vmem:[%s5610_s1 + $0x2b0] sm:$0xf0]  ;;  %v3622_v47 = vld [vmem:[%s5610_s1 + $0x3a4] sm:$0xf] }
  0x3d   :  { %1309 = vmatpush.bf16.msrb.mxu1 %v3025_v2  ;;  %v3654_v49 = vld [vmem:[%s5610_s1 + $0x4a4] sm:$0xf]  ;;  %v2709_v53 = vor.u32 %v3590_v43, %v2706_v46  ;;  %v2837_v54 = vor.u32 %v3622_v47, %v2834_v48  ;;  %v3090_v58 = vld [vmem:[%s5610_s1 + $0x5b0] sm:$0xf0] }
  0x3e   :  { %v3686_v56 = vld [vmem:[%s5610_s1 + $0x5a4] sm:$0xf]  ;;  %v2965_v60 = vor.u32 %v3654_v49, %v2962_v50  ;;  %v2818_v63 = vld [vmem:[%s5610_s1 + $0x390] sm:$0xf0] }
  0x3f   :  { %1335 = vmatpush.bf16.msrb.mxu3 %v2389_v3  ;;  %v3586_v59 = vld [vmem:[%s5610_s1 + $0x284] sm:$0xf]  ;;  %v2946_v1 = vld [vmem:[%s5610_s1 + $0x490] sm:$0xf0]  ;;  %v3093_v2 = vor.u32 %v3686_v56, %v3090_v58  ;;  %v2488_v56 = vld [vmem:[%s5610_s1 + $0xe8] sm:$0xf] }
  0x40   :  { %1347 = vmatpush.bf16.msra.mxu2 %v2533_v61  ;;  %1297 = vmatpush.bf16.msrb.mxu0 %v2881_v15  ;;  %v2690_v61 = vld [vmem:[%s5610_s1 + $0x290] sm:$0xf0]  ;;  %v3618_v62 = vld [vmem:[%s5610_s1 + $0x384] sm:$0xf]  ;;  %v3537_v58 = vld [vmem:[%s5610_s1 + $0xf4] sm:$0xf0] }
  0x41   :  { %1310 = vmatpush.bf16.msrb.mxu1 %v3009_v19  ;;  %v3650_v0 = vld [vmem:[%s5610_s1 + $0x484] sm:$0xf]  ;;  %v2693_v3 = vor.u32 %v3586_v59, %v2690_v61  ;;  %v2821_v4 = vor.u32 %v3618_v62, %v2818_v63  ;;  %v3074_v6 = vld [vmem:[%s5610_s1 + $0x590] sm:$0xf0]  ;;  %v2616_v59 = vld [vmem:[%s5610_s1 + $0x1e8] sm:$0xf] }
  0x42   :  { %v3682_v5 = vld [vmem:[%s5610_s1 + $0x584] sm:$0xf]  ;;  %v2949_v9 = vor.u32 %v3650_v0, %v2946_v1  ;;  %v2674_v10 = vld [vmem:[%s5610_s1 + $0x270] sm:$0xf0]  ;;  %v3569_v61 = vld [vmem:[%s5610_s1 + $0x1f4] sm:$0xf0] }
  0x43   :  { %1336 = vmatpush.bf16.msrb.mxu3 %v2373_v20  ;;  %1298 = vmatmul.bf16.vlgmr.msrb.gmra.mxu0 %v4324_v30  ;;  %v3582_v8 = vld [vmem:[%s5610_s1 + $0x264] sm:$0xf]  ;;  %v2802_v12 = vld [vmem:[%s5610_s1 + $0x370] sm:$0xf0]  ;;  %v3077_v15 = vor.u32 %v3682_v5, %v3074_v6  ;;  %v2489_v6 = vor.u32 %v3537_v58, %v2488_v56 }
  0x44   :  { %1348 = vmatpush.bf16.msra.mxu2 %v2517_v14  ;;  %1355 = vmatpush.bf16.msra.mxu0 %v2741_v24  ;;  %v3614_v11 = vld [vmem:[%s5610_s1 + $0x364] sm:$0xf]  ;;  %v2930_v14 = vld [vmem:[%s5610_s1 + $0x470] sm:$0xf0]  ;;  %v2677_v16 = vor.u32 %v3582_v8, %v2674_v10  ;;  %v3601_v8 = vld [vmem:[%s5610_s1 + $0x2f4] sm:$0xf0] }
  0x45   :  { %1368 = vmatpush.bf16.msra.mxu1 %v2869_v25  ;;  %v3646_v13 = vld [vmem:[%s5610_s1 + $0x464] sm:$0xf]  ;;  %v2805_v17 = vor.u32 %v3614_v11, %v2802_v12  ;;  %v3058_v19 = vld [vmem:[%s5610_s1 + $0x570] sm:$0xf0]  ;;  %v3633_v10 = vld [vmem:[%s5610_s1 + $0x3f4] sm:$0xf0]  ;;  %v2617_v11 = vor.u32 %v3569_v61, %v2616_v59 }
  0x46   :  { %1311 = vmatmul.bf16.vlgmr.msrb.gmra.mxu1 %v4335_v35  ;;  %1337 = vmatmul.bf16.vlgmr.msrb.gmra.mxu3 %v4121_v55  ;;  %v3678_v18 = vld [vmem:[%s5610_s1 + $0x564] sm:$0xf]  ;;  %v2933_v21 = vor.u32 %v3646_v13, %v2930_v14  ;;  %v2658_v22 = vld [vmem:[%s5610_s1 + $0x250] sm:$0xf0]  ;;  %v2472_v13 = vld [vmem:[%s5610_s1 + $0xc8] sm:$0xf] }
  0x47   :  { %1381 = vmatpush.bf16.msra.mxu3 %v2997_v29  ;;  %v3578_v20 = vld [vmem:[%s5610_s1 + $0x244] sm:$0xf]  ;;  %v2786_v24 = vld [vmem:[%s5610_s1 + $0x350] sm:$0xf0]  ;;  %v3061_v27 = vor.u32 %v3678_v18, %v3058_v19  ;;  %v3533_v14 = vld [vmem:[%s5610_s1 + $0xd4] sm:$0xf0] }
  0x48   :  { %1349 = vmatpush.bf16.msra.mxu2 %v2501_v34  ;;  %1356 = vmatpush.bf16.msra.mxu0 %v2725_v39  ;;  %v3610_v23 = vld [vmem:[%s5610_s1 + $0x344] sm:$0xf]  ;;  %v2914_v26 = vld [vmem:[%s5610_s1 + $0x450] sm:$0xf0]  ;;  %v2661_v28 = vor.u32 %v3578_v20, %v2658_v22  ;;  %v2728_v20 = vld [vmem:[%s5610_s1 + $0x2c8] sm:$0xf] }
  0x49   :  { %1369 = vmatpush.bf16.msra.mxu1 %v2853_v40  ;;  %v3642_v25 = vld [vmem:[%s5610_s1 + $0x444] sm:$0xf]  ;;  %v2789_v29 = vor.u32 %v3610_v23, %v2786_v24  ;;  %v3042_v32 = vld [vmem:[%s5610_s1 + $0x550] sm:$0xf0]  ;;  %v3597_v22 = vld [vmem:[%s5610_s1 + $0x2d4] sm:$0xf0] }
  0x4a   :  { %v3674_v31 = vld [vmem:[%s5610_s1 + $0x544] sm:$0xf]  ;;  %v2917_v34 = vor.u32 %v3642_v25, %v2914_v26  ;;  %v2642_v36 = vld [vmem:[%s5610_s1 + $0x230] sm:$0xf0]  ;;  %v2856_v23 = vld [vmem:[%s5610_s1 + $0x3c8] sm:$0xf] }
  0x4b   :  { %1382 = vmatpush.bf16.msra.mxu3 %v2981_v44  ;;  %1350 = vmatmul.bf16.vlgmr.msra.gmra.mxu2 %v4154_v7  ;;  %v3574_v33 = vld [vmem:[%s5610_s1 + $0x224] sm:$0xf]  ;;  %v2898_v40 = vld [vmem:[%s5610_s1 + $0x430] sm:$0xf0]  ;;  %v3045_v41 = vor.u32 %v3674_v31, %v3042_v32  ;;  %v3629_v24 = vld [vmem:[%s5610_s1 + $0x3d4] sm:$0xf0]  ;;  %v2729_v31 = vor.u32 %v3597_v22, %v2728_v20 }
  0x4c   :  { %1394 = vmatpush.bf16.msrb.mxu2 %v3125_v38  ;;  %1357 = vmatpush.bf16.msra.mxu0 %v2709_v53  ;;  %v3606_v37 = vld [vmem:[%s5610_s1 + $0x324] sm:$0xf]  ;;  %v2770_v38 = vld [vmem:[%s5610_s1 + $0x330] sm:$0xf0]  ;;  %v2645_v44 = vor.u32 %v3574_v33, %v2642_v36  ;;  %v2456_v26 = vld [vmem:[%s5610_s1 + $0xa8] sm:$0xf]  ;;  %v2857_v32 = vor.u32 %v3629_v24, %v2856_v23 }
  0x4d   :  { %1370 = vmatpush.bf16.msra.mxu1 %v2837_v54  ;;  %v3638_v39 = vld [vmem:[%s5610_s1 + $0x424] sm:$0xf]  ;;  %v3026_v43 = vld [vmem:[%s5610_s1 + $0x530] sm:$0xf0]  ;;  %v2773_v46 = vor.u32 %v3606_v37, %v2770_v38  ;;  %v2712_v33 = vld [vmem:[%s5610_s1 + $0x2a8] sm:$0xf] }
  0x4e   :  { %v3670_v42 = vld [vmem:[%s5610_s1 + $0x524] sm:$0xf]  ;;  %v2626_v48 = vld [vmem:[%s5610_s1 + $0x210] sm:$0xf0]  ;;  %v2901_v50 = vor.u32 %v3638_v39, %v2898_v40  ;;  %v2840_v37 = vld [vmem:[%s5610_s1 + $0x3a8] sm:$0xf] }
  0x4f   :  { %1383 = vmatpush.bf16.msra.mxu3 %v2965_v60  ;;  %v3570_v47 = vld [vmem:[%s5610_s1 + $0x204] sm:$0xf]  ;;  %v2882_v54 = vld [vmem:[%s5610_s1 + $0x410] sm:$0xf0]  ;;  %v3029_v60 = vor.u32 %v3670_v42, %v3026_v43  ;;  %v3625_v38 = vld [vmem:[%s5610_s1 + $0x3b4] sm:$0xf0] }
  0x50   :  { %1395 = vmatpush.bf16.msrb.mxu2 %v3109_v52  ;;  %1358 = vmatpush.bf16.msra.mxu0 %v2693_v3  ;;  %v3602_v49 = vld [vmem:[%s5610_s1 + $0x304] sm:$0xf]  ;;  %v2754_v52 = vld [vmem:[%s5610_s1 + $0x310] sm:$0xf0]  ;;  %v2629_v0 = vor.u32 %v3570_v47, %v2626_v48 }
  0x51   :  { %1371 = vmatpush.bf16.msra.mxu1 %v2821_v4  ;;  %v3634_v53 = vld [vmem:[%s5610_s1 + $0x404] sm:$0xf]  ;;  %v3138_v63 = vld [vmem:[%s5610_s1 + $0x610] sm:$0xf0]  ;;  %v2757_v1 = vor.u32 %v3602_v49, %v2754_v52  ;;  %v2744_v4 = vld [vmem:[%s5610_s1 + $0x2e8] sm:$0xf] }
  0x52   :  { %v3698_v62 = vld [vmem:[%s5610_s1 + $0x604] sm:$0xf]  ;;  %v3010_v3 = vld [vmem:[%s5610_s1 + $0x510] sm:$0xf0]  ;;  %v2885_v5 = vor.u32 %v3634_v53, %v2882_v54  ;;  %v2745_v18 = vor.u32 %v3601_v8, %v2744_v4 }
  0x53   :  { %1384 = vmatpush.bf16.msra.mxu3 %v2949_v9  ;;  %v2872_v9 = vld [vmem:[%s5610_s1 + $0x3e8] sm:$0xf]  ;;  %v3141_v12 = vor.u32 %v3698_v62, %v3138_v63 }
  0x54   :  { %1396 = vmatpush.bf16.msrb.mxu2 %v3093_v2  ;;  %1359 = vmatpush.bf16.msra.mxu0 %v2677_v16  ;;  %v3666_v2 = vld [vmem:[%s5610_s1 + $0x504] sm:$0xf]  ;;  %v2600_v16 = vld [vmem:[%s5610_s1 + $0x1c8] sm:$0xf]  ;;  %v2873_v19 = vor.u32 %v3633_v10, %v2872_v9 }
  0x55   :  { %1372 = vmatpush.bf16.msra.mxu1 %v2805_v17  ;;  %v3565_v17 = vld [vmem:[%s5610_s1 + $0x1d4] sm:$0xf0] }
  0x56   :  { %v2601_v25 = vor.u32 %v3565_v17, %v2600_v16 }
  0x57   :  { %1385 = vmatpush.bf16.msra.mxu3 %v2933_v21  ;;  %v2473_v21 = vor.u32 %v3533_v14, %v2472_v13 }
  0x58   :  { %1397 = vmatpush.bf16.msrb.mxu2 %v3077_v15  ;;  %1360 = vmatpush.bf16.msra.mxu0 %v2661_v28  ;;  %v3013_v15 = vor.u32 %v3666_v2, %v3010_v3  ;;  %v2584_v28 = vld [vmem:[%s5610_s1 + $0x1a8] sm:$0xf] }
  0x59   :  { %1373 = vmatpush.bf16.msra.mxu1 %v2789_v29  ;;  %v3561_v29 = vld [vmem:[%s5610_s1 + $0x1b4] sm:$0xf0] }
  0x5b   :  { %1386 = vmatpush.bf16.msra.mxu3 %v2917_v34  ;;  %v3593_v34 = vld [vmem:[%s5610_s1 + $0x2b4] sm:$0xf0] }
  0x5c   :  { %1398 = vmatpush.bf16.msrb.mxu2 %v3061_v27  ;;  %1361 = vmatpush.bf16.msra.mxu0 %v2645_v44  ;;  %v3529_v27 = vld [vmem:[%s5610_s1 + $0xb4] sm:$0xf0] }
  0x5d   :  { %1374 = vmatpush.bf16.msra.mxu1 %v2773_v46  ;;  %v2457_v36 = vor.u32 %v3529_v27, %v2456_v26 }
  0x5f   :  { %1387 = vmatpush.bf16.msra.mxu3 %v2901_v50 }
  0x60   :  { %1399 = vmatpush.bf16.msrb.mxu2 %v3045_v41  ;;  %1362 = vmatpush.bf16.msra.mxu0 %v2629_v0 }
  0x61   :  { %1375 = vmatpush.bf16.msra.mxu1 %v2757_v1 }
  0x63   :  { %1388 = vmatpush.bf16.msra.mxu3 %v2885_v5  ;;  %1363 = vmatmul.bf16.vlgmr.msra.gmra.mxu0 %v4110_v51 }
  0x64   :  { %1400 = vmatpush.bf16.msrb.mxu2 %v3029_v60  ;;  %1414 = vmatpush.bf16.msrb.mxu0 %v3141_v12 }
  0x65   :  { %1420 = vmatpush.bf16.msrb.mxu1 %v2489_v6 }
  0x66   :  { %1389 = vmatmul.bf16.vlgmr.msra.gmra.mxu3 %v4324_v30 }
  0x67   :  { %1433 = vmatpush.bf16.msrb.mxu3 %v2617_v11 }
  0x68   :  { %1401 = vmatpush.bf16.msrb.mxu2 %v3013_v15  ;;  %1446 = vmatpush.bf16.msra.mxu0 %v2745_v18 }
  0x69   :  { %1421 = vmatpush.bf16.msrb.mxu1 %v2473_v21 }
  0x6c   :  { %1459 = vmatpush.bf16.msra.mxu2 %v2873_v19 }
  0x6d   :  { %14 = vsyncpa [#allocation3], 0  ;;  %1434 = vmatpush.bf16.msrb.mxu3 %v2601_v25  ;;  %v2585_v39 = vor.u32 %v3561_v29, %v2584_v28  ;;  %1402 = vmatmul.bf16.vlgmr.msrb.gmra.mxu2 %v4335_v35  ;;  %v2440_v40 = vld [vmem:[%s5610_s1 + $0x88] sm:$0xf]  ;;  %v3525_v41 = vld [vmem:[%s5610_s1 + $0x94] sm:$0xf0]  ;;  %v2713_v44 = vor.u32 %v3593_v34, %v2712_v33  ;;  %v2841_v46 = vor.u32 %v3625_v38, %v2840_v37 }
  0x6e   :  { %1376 = vmatmul.bf16.vlgmr.msra.gmra.mxu1 %v4123_v57  ;;  %v2568_v42 = vld [vmem:[%s5610_s1 + $0x188] sm:$0xf]  ;;  %v3557_v43 = vld [vmem:[%s5610_s1 + $0x194] sm:$0xf0]  ;;  %1447 = vmatpush.bf16.msra.mxu0 %v2729_v31  ;;  %v2441_v48 = vor.u32 %v3525_v41, %v2440_v40  ;;  %s2357_s24 = sshll.u32 %s5618_s9, 4  ;;  %s2358_s24 = int_to_ptr.hbm [resolvable:$true] %s2357_s24 }
  0x6f   :  { %v2696_v47 = vld [vmem:[%s5610_s1 + $0x288] sm:$0xf]  ;;  %1422 = vmatpush.bf16.msrb.mxu1 %v2457_v36  ;;  %v3589_v49 = vld [vmem:[%s5610_s1 + $0x294] sm:$0xf0]  ;;  %v2569_v53 = vor.u32 %v3557_v43, %v2568_v42 }
  0x70   :  { %1460 = vmatpush.bf16.msra.mxu2 %v2857_v32  ;;  %v2824_v50 = vld [vmem:[%s5610_s1 + $0x388] sm:$0xf]  ;;  %v3621_v52 = vld [vmem:[%s5610_s1 + $0x394] sm:$0xf0]  ;;  %v2697_v60 = vor.u32 %v3589_v49, %v2696_v47  ;;  %v3535_v47 = vld [vmem:[%s5610_s1 + $0xec] sm:$0xf] }
  0x71   :  { %1435 = vmatpush.bf16.msrb.mxu3 %v2585_v39  ;;  %v2424_v54 = vld [vmem:[%s5610_s1 + $0x68] sm:$0xf]  ;;  %v3521_v56 = vld [vmem:[%s5610_s1 + $0x74] sm:$0xf0]  ;;  %v2825_v61 = vor.u32 %v3621_v52, %v2824_v50  ;;  %v2490_v50 = vld [vmem:[%s5610_s1 + $0xf8] sm:$0xf0] }
  0x72   :  { %v2552_v58 = vld [vmem:[%s5610_s1 + $0x168] sm:$0xf]  ;;  %v3553_v59 = vld [vmem:[%s5610_s1 + $0x174] sm:$0xf0]  ;;  %1448 = vmatpush.bf16.msra.mxu0 %v2713_v44  ;;  %v2425_v63 = vor.u32 %v3521_v56, %v2424_v54 }
  0x73   :  { %v2680_v62 = vld [vmem:[%s5610_s1 + $0x268] sm:$0xf]  ;;  %1423 = vmatpush.bf16.msrb.mxu1 %v2441_v48  ;;  %v3585_v0 = vld [vmem:[%s5610_s1 + $0x274] sm:$0xf0]  ;;  %v2553_v3 = vor.u32 %v3553_v59, %v2552_v58  ;;  %3151 = vmatmul.msk.bf16.vlgmr.msrb.gmra.mxu0 %vm1234_vm0, %v4233_v45 }
  0x74   :  { %1461 = vmatpush.bf16.msra.mxu2 %v2841_v46  ;;  %v2808_v1 = vld [vmem:[%s5610_s1 + $0x368] sm:$0xf]  ;;  %v3617_v2 = vld [vmem:[%s5610_s1 + $0x374] sm:$0xf0]  ;;  %v2681_v9 = vor.u32 %v3585_v0, %v2680_v62 }
  0x75   :  { %1436 = vmatpush.bf16.msrb.mxu3 %v2569_v53  ;;  %v2408_v4 = vld [vmem:[%s5610_s1 + $0x48] sm:$0xf]  ;;  %v3517_v5 = vld [vmem:[%s5610_s1 + $0x54] sm:$0xf0]  ;;  %v2809_v10 = vor.u32 %v3617_v2, %v2808_v1  ;;  %v3567_v1 = vld [vmem:[%s5610_s1 + $0x1ec] sm:$0xf] }
  0x76   :  { %v2536_v6 = vld [vmem:[%s5610_s1 + $0x148] sm:$0xf]  ;;  %v3549_v8 = vld [vmem:[%s5610_s1 + $0x154] sm:$0xf0]  ;;  %1449 = vmatpush.bf16.msra.mxu0 %v2697_v60  ;;  %v2409_v12 = vor.u32 %v3517_v5, %v2408_v4  ;;  %v2618_v2 = vld [vmem:[%s5610_s1 + $0x1f8] sm:$0xf0] }
  0x77   :  { %v2664_v11 = vld [vmem:[%s5610_s1 + $0x248] sm:$0xf]  ;;  %1424 = vmatpush.bf16.msrb.mxu1 %v2425_v63  ;;  %v3581_v13 = vld [vmem:[%s5610_s1 + $0x254] sm:$0xf0]  ;;  %v2537_v16 = vor.u32 %v3549_v8, %v2536_v6  ;;  %v2493_v63 = vor.u32 %v3535_v47, %v2490_v50  ;;  %v3531_v4 = vld [vmem:[%s5610_s1 + $0xcc] sm:$0xf] }
  0x78   :  { %1462 = vmatpush.bf16.msra.mxu2 %v2825_v61  ;;  %v2792_v14 = vld [vmem:[%s5610_s1 + $0x348] sm:$0xf]  ;;  %v3613_v15 = vld [vmem:[%s5610_s1 + $0x354] sm:$0xf0]  ;;  %v2665_v21 = vor.u32 %v3581_v13, %v2664_v11  ;;  %v2474_v5 = vld [vmem:[%s5610_s1 + $0xd8] sm:$0xf0] }
  0x79   :  { %1437 = vmatpush.bf16.msrb.mxu3 %v2553_v3  ;;  %v2392_v17 = vld [vmem:[%s5610_s1 + $0x28] sm:$0xf]  ;;  %v3513_v18 = vld [vmem:[%s5610_s1 + $0x34] sm:$0xf0]  ;;  %v2793_v22 = vor.u32 %v3613_v15, %v2792_v14  ;;  %v2477_v13 = vor.u32 %v3531_v4, %v2474_v5  ;;  %v3563_v14 = vld [vmem:[%s5610_s1 + $0x1cc] sm:$0xf] }
  0x7a   :  { %v2520_v19 = vld [vmem:[%s5610_s1 + $0x128] sm:$0xf]  ;;  %v3545_v20 = vld [vmem:[%s5610_s1 + $0x134] sm:$0xf0]  ;;  %1450 = vmatpush.bf16.msra.mxu0 %v2681_v9  ;;  %v2393_v25 = vor.u32 %v3513_v18, %v2392_v17  ;;  %v2602_v15 = vld [vmem:[%s5610_s1 + $0x1d8] sm:$0xf0] }
  0x7b   :  { %v2648_v23 = vld [vmem:[%s5610_s1 + $0x228] sm:$0xf]  ;;  %v3577_v24 = vld [vmem:[%s5610_s1 + $0x234] sm:$0xf0]  ;;  %1425 = vmatpush.bf16.msrb.mxu1 %v2409_v12  ;;  %v2521_v29 = vor.u32 %v3545_v20, %v2520_v19  ;;  %v3527_v17 = vld [vmem:[%s5610_s1 + $0xac] sm:$0xf] }
  0x7c   :  { %1463 = vmatpush.bf16.msra.mxu2 %v2809_v10  ;;  %v2776_v26 = vld [vmem:[%s5610_s1 + $0x328] sm:$0xf]  ;;  %v3609_v27 = vld [vmem:[%s5610_s1 + $0x334] sm:$0xf0]  ;;  %v2649_v38 = vor.u32 %v3577_v24, %v2648_v23  ;;  %v2621_v10 = vor.u32 %v3567_v1, %v2618_v2  ;;  %v2458_v18 = vld [vmem:[%s5610_s1 + $0xb8] sm:$0xf0] }
  0x7d   :  { %v2376_v28 = vld [vmem:[%s5610_s1 + $0x8] sm:$0xf]  ;;  %1438 = vmatpush.bf16.msrb.mxu3 %v2537_v16  ;;  %v3509_v31 = vld [vmem:[%s5610_s1 + $0x14] sm:$0xf0]  ;;  %v2777_v39 = vor.u32 %v3609_v27, %v2776_v26  ;;  %v3559_v26 = vld [vmem:[%s5610_s1 + $0x1ac] sm:$0xf] }
  0x7e   :  { %v2504_v32 = vld [vmem:[%s5610_s1 + $0x108] sm:$0xf]  ;;  %v3541_v33 = vld [vmem:[%s5610_s1 + $0x114] sm:$0xf0]  ;;  %1451 = vmatpush.bf16.msra.mxu0 %v2665_v21  ;;  %v2377_v43 = vor.u32 %v3509_v31, %v2376_v28  ;;  %v2586_v27 = vld [vmem:[%s5610_s1 + $0x1b8] sm:$0xf0] }
  0x7f   :  { %v3000_v34 = vld [vmem:[%s5610_s1 + $0x4e8] sm:$0xf]  ;;  %v3665_v36 = vld [vmem:[%s5610_s1 + $0x4f4] sm:$0xf0]  ;;  %1426 = vmatpush.bf16.msrb.mxu1 %v2393_v25  ;;  %v2505_v48 = vor.u32 %v3541_v33, %v2504_v32  ;;  %v2461_v25 = vor.u32 %v3527_v17, %v2458_v18  ;;  %v2442_v31 = vld [vmem:[%s5610_s1 + $0x98] sm:$0xf0] }
  0x80   :  { %v3128_v37 = vld [vmem:[%s5610_s1 + $0x5e8] sm:$0xf]  ;;  %1464 = vmatpush.bf16.msra.mxu2 %v2793_v22  ;;  %v3697_v40 = vld [vmem:[%s5610_s1 + $0x5f4] sm:$0xf0]  ;;  %v3001_v49 = vor.u32 %v3665_v36, %v3000_v34  ;;  %v2605_v22 = vor.u32 %v3563_v14, %v2602_v15  ;;  %v2589_v36 = vor.u32 %v3559_v26, %v2586_v27  ;;  %v3547_v4 = vld [vmem:[%s5610_s1 + $0x14c] sm:$0xf] }
  0x81   :  { %v2632_v41 = vld [vmem:[%s5610_s1 + $0x208] sm:$0xf]  ;;  %v3573_v42 = vld [vmem:[%s5610_s1 + $0x214] sm:$0xf0]  ;;  %1439 = vmatpush.bf16.msrb.mxu3 %v2521_v29  ;;  %v3129_v54 = vor.u32 %v3697_v40, %v3128_v37  ;;  %v3523_v29 = vld [vmem:[%s5610_s1 + $0x8c] sm:$0xf] }
  0x82   :  { %v2760_v44 = vld [vmem:[%s5610_s1 + $0x308] sm:$0xf]  ;;  %v3605_v46 = vld [vmem:[%s5610_s1 + $0x314] sm:$0xf0]  ;;  %1452 = vmatpush.bf16.msra.mxu0 %v2649_v38  ;;  %v2633_v59 = vor.u32 %v3573_v42, %v2632_v41  ;;  %v3555_v40 = vld [vmem:[%s5610_s1 + $0x18c] sm:$0xf] }
  0x83   :  { %v3144_v52 = vld [vmem:[%s5610_s1 + $0x608] sm:$0xf]  ;;  %v3701_v53 = vld [vmem:[%s5610_s1 + $0x614] sm:$0xf0]  ;;  %v2761_v60 = vor.u32 %v3605_v46, %v2760_v44  ;;  %1427 = vmatpush.bf16.msrb.mxu1 %v2377_v43  ;;  %v2570_v41 = vld [vmem:[%s5610_s1 + $0x198] sm:$0xf0] }
  0x84   :  { %v2984_v56 = vld [vmem:[%s5610_s1 + $0x4c8] sm:$0xf]  ;;  %v3661_v58 = vld [vmem:[%s5610_s1 + $0x4d4] sm:$0xf0]  ;;  %1465 = vmatpush.bf16.msra.mxu2 %v2777_v39  ;;  %v3145_v0 = vor.u32 %v3701_v53, %v3144_v52  ;;  %v2445_v39 = vor.u32 %v3523_v29, %v2442_v31  ;;  %v3519_v43 = vld [vmem:[%s5610_s1 + $0x6c] sm:$0xf] }
  0x85   :  { %v3112_v61 = vld [vmem:[%s5610_s1 + $0x5c8] sm:$0xf]  ;;  %v3693_v62 = vld [vmem:[%s5610_s1 + $0x5d4] sm:$0xf0]  ;;  %1440 = vmatpush.bf16.msrb.mxu3 %v2505_v48  ;;  %v2985_v3 = vor.u32 %v3661_v58, %v2984_v56  ;;  %v2426_v44 = vld [vmem:[%s5610_s1 + $0x78] sm:$0xf0] }
  0x86   :  { %v3113_v6 = vor.u32 %v3693_v62, %v3112_v61  ;;  %v2968_v8 = vld [vmem:[%s5610_s1 + $0x4a8] sm:$0xf]  ;;  %v3657_v9 = vld [vmem:[%s5610_s1 + $0x4b4] sm:$0xf0]  ;;  %1453 = vmatpush.bf16.msra.mxu0 %v2633_v59  ;;  %1428 = vmatmul.bf16.vlgmr.msrb.gmra.mxu1 %v4121_v55  ;;  %v2429_v53 = vor.u32 %v3519_v43, %v2426_v44  ;;  %v2554_v56 = vld [vmem:[%s5610_s1 + $0x178] sm:$0xf0] }
  0x87   :  { %1472 = vmatpush.bf16.msra.mxu1 %v3001_v49  ;;  %v3096_v11 = vld [vmem:[%s5610_s1 + $0x5a8] sm:$0xf]  ;;  %v3689_v12 = vld [vmem:[%s5610_s1 + $0x5b4] sm:$0xf0]  ;;  %v2969_v16 = vor.u32 %v3657_v9, %v2968_v8  ;;  %v2573_v49 = vor.u32 %v3555_v40, %v2570_v41  ;;  %v3515_v59 = vld [vmem:[%s5610_s1 + $0x4c] sm:$0xf] }
  0x88   :  { %1466 = vmatpush.bf16.msra.mxu2 %v2761_v60  ;;  %1441 = vmatmul.bf16.vlgmr.msrb.gmra.mxu3 %v4154_v7  ;;  %v3097_v19 = vor.u32 %v3689_v12, %v3096_v11  ;;  %v2952_v20 = vld [vmem:[%s5610_s1 + $0x488] sm:$0xf]  ;;  %v3653_v21 = vld [vmem:[%s5610_s1 + $0x494] sm:$0xf0]  ;;  %v2410_v60 = vld [vmem:[%s5610_s1 + $0x58] sm:$0xf0] }
  0x89   :  { %1485 = vmatpush.bf16.msra.mxu3 %v3129_v54  ;;  %1454 = vmatmul.bf16.vlgmr.msra.gmra.mxu0 %v4110_v51  ;;  %v3080_v23 = vld [vmem:[%s5610_s1 + $0x588] sm:$0xf]  ;;  %v3685_v24 = vld [vmem:[%s5610_s1 + $0x594] sm:$0xf0]  ;;  %v2953_v28 = vor.u32 %v3653_v21, %v2952_v20  ;;  %v3551_v54 = vld [vmem:[%s5610_s1 + $0x16c] sm:$0xf] }
  0x8a   :  { %1505 = vmatpush.bf16.msrb.mxu0 %v3145_v0  ;;  %v3081_v32 = vor.u32 %v3685_v24, %v3080_v23  ;;  %v2936_v33 = vld [vmem:[%s5610_s1 + $0x468] sm:$0xf]  ;;  %v3649_v34 = vld [vmem:[%s5610_s1 + $0x474] sm:$0xf0]  ;;  %v2557_v0 = vor.u32 %v3551_v54, %v2554_v56  ;;  %v2538_v5 = vld [vmem:[%s5610_s1 + $0x158] sm:$0xf0] }
  0x8b   :  { %1473 = vmatpush.bf16.msra.mxu1 %v2985_v3  ;;  %1467 = vmatmul.bf16.vlgmr.msra.gmra.mxu2 %v4123_v57  ;;  %v3064_v37 = vld [vmem:[%s5610_s1 + $0x568] sm:$0xf]  ;;  %v3681_v38 = vld [vmem:[%s5610_s1 + $0x574] sm:$0xf0]  ;;  %v2937_v42 = vor.u32 %v3649_v34, %v2936_v33  ;;  %v2413_v3 = vor.u32 %v3515_v59, %v2410_v60  ;;  %v3511_v8 = vld [vmem:[%s5610_s1 + $0x2c] sm:$0xf]  ;;  %v2541_v15 = vor.u32 %v3547_v4, %v2538_v5 }
  0x8c   :  { %1511 = vmatpush.bf16.msrb.mxu2 %v2493_v63  ;;  %v3065_v46 = vor.u32 %v3681_v38, %v3064_v37  ;;  %v2920_v47 = vld [vmem:[%s5610_s1 + $0x448] sm:$0xf]  ;;  %v3645_v48 = vld [vmem:[%s5610_s1 + $0x454] sm:$0xf0]  ;;  %v2394_v9 = vld [vmem:[%s5610_s1 + $0x38] sm:$0xf0] }
  0x8d   :  { %1486 = vmatpush.bf16.msra.mxu3 %v3113_v6  ;;  %v3048_v50 = vld [vmem:[%s5610_s1 + $0x548] sm:$0xf]  ;;  %v3677_v52 = vld [vmem:[%s5610_s1 + $0x554] sm:$0xf0]  ;;  %v2921_v58 = vor.u32 %v3645_v48, %v2920_v47  ;;  %v2746_v17 = vld [vmem:[%s5610_s1 + $0x2f8] sm:$0xf0] }
  0x8e   :  { %1524 = vmatpush.bf16.msra.mxu0 %v2621_v10  ;;  %v3049_v61 = vor.u32 %v3677_v52, %v3048_v50  ;;  %v2904_v62 = vld [vmem:[%s5610_s1 + $0x428] sm:$0xf]  ;;  %v3641_v63 = vld [vmem:[%s5610_s1 + $0x434] sm:$0xf0]  ;;  %v3631_v18 = vld [vmem:[%s5610_s1 + $0x3ec] sm:$0xf] }
  0x8f   :  { %1474 = vmatpush.bf16.msra.mxu1 %v2969_v16  ;;  %v3032_v1 = vld [vmem:[%s5610_s1 + $0x528] sm:$0xf]  ;;  %v3673_v2 = vld [vmem:[%s5610_s1 + $0x534] sm:$0xf0]  ;;  %v2905_v6 = vor.u32 %v3641_v63, %v2904_v62  ;;  %v3599_v16 = vld [vmem:[%s5610_s1 + $0x2ec] sm:$0xf] }
  0x90   :  { %1512 = vmatpush.bf16.msrb.mxu2 %v2477_v13  ;;  %v2888_v10 = vld [vmem:[%s5610_s1 + $0x408] sm:$0xf]  ;;  %v3033_v11 = vor.u32 %v3673_v2, %v3032_v1  ;;  %v3637_v12 = vld [vmem:[%s5610_s1 + $0x414] sm:$0xf0]  ;;  %v2874_v20 = vld [vmem:[%s5610_s1 + $0x3f8] sm:$0xf0]  ;;  %v2749_v27 = vor.u32 %v3599_v16, %v2746_v17 }
  0x91   :  { %1487 = vmatpush.bf16.msra.mxu3 %v3097_v19  ;;  %v3016_v13 = vld [vmem:[%s5610_s1 + $0x508] sm:$0xf]  ;;  %v3669_v14 = vld [vmem:[%s5610_s1 + $0x514] sm:$0xf0]  ;;  %v2397_v19 = vor.u32 %v3511_v8, %v2394_v9  ;;  %v3543_v21 = vld [vmem:[%s5610_s1 + $0x12c] sm:$0xf]  ;;  %v2889_v23 = vor.u32 %v3637_v12, %v2888_v10  ;;  %v2877_v31 = vor.u32 %v3631_v18, %v2874_v20 }
  0x92   :  { %1525 = vmatpush.bf16.msra.mxu0 %v2605_v22  ;;  %v2522_v22 = vld [vmem:[%s5610_s1 + $0x138] sm:$0xf0]  ;;  %v3507_v24 = vld [vmem:[%s5610_s1 + $0xc] sm:$0xf]  ;;  %v3017_v26 = vor.u32 %v3669_v14, %v3016_v13 }
  0x93   :  { %1475 = vmatpush.bf16.msra.mxu1 %v2953_v28  ;;  %v3663_v28 = vld [vmem:[%s5610_s1 + $0x4ec] sm:$0xf]  ;;  %v3002_v29 = vld [vmem:[%s5610_s1 + $0x4f8] sm:$0xf0] }
  0x94   :  { %1513 = vmatpush.bf16.msrb.mxu2 %v2461_v25  ;;  %v2378_v25 = vld [vmem:[%s5610_s1 + $0x18] sm:$0xf0]  ;;  %v3595_v33 = vld [vmem:[%s5610_s1 + $0x2cc] sm:$0xf]  ;;  %v3005_v41 = vor.u32 %v3663_v28, %v3002_v29 }
  0x95   :  { %1488 = vmatpush.bf16.msra.mxu3 %v3081_v32  ;;  %v2525_v32 = vor.u32 %v3543_v21, %v2522_v22  ;;  %v2730_v34 = vld [vmem:[%s5610_s1 + $0x2d8] sm:$0xf0]  ;;  %v2381_v37 = vor.u32 %v3507_v24, %v2378_v25  ;;  %v3591_v50 = vld [vmem:[%s5610_s1 + $0x2ac] sm:$0xf] }
  0x96   :  { %1526 = vmatpush.bf16.msra.mxu0 %v2589_v36  ;;  %v3627_v36 = vld [vmem:[%s5610_s1 + $0x3cc] sm:$0xf]  ;;  %v2858_v38 = vld [vmem:[%s5610_s1 + $0x3d8] sm:$0xf0]  ;;  %v2733_v44 = vor.u32 %v3595_v33, %v2730_v34 }
  0x97   :  { %1476 = vmatpush.bf16.msra.mxu1 %v2937_v42  ;;  %v2506_v40 = vld [vmem:[%s5610_s1 + $0x118] sm:$0xf0]  ;;  %v3695_v42 = vld [vmem:[%s5610_s1 + $0x5ec] sm:$0xf]  ;;  %v2861_v48 = vor.u32 %v3627_v36, %v2858_v38 }
  0x98   :  { %1514 = vmatpush.bf16.msrb.mxu2 %v2445_v39  ;;  %v3539_v39 = vld [vmem:[%s5610_s1 + $0x10c] sm:$0xf]  ;;  %v3130_v43 = vld [vmem:[%s5610_s1 + $0x5f8] sm:$0xf0] }
  0x99   :  { %1489 = vmatpush.bf16.msra.mxu3 %v3065_v46  ;;  %3152 = vmatmul.msk.bf16.vlgmr.msrb.gmra.mxu0 %vm1234_vm0, %v4233_v45  ;;  %v3659_v46 = vld [vmem:[%s5610_s1 + $0x4cc] sm:$0xf]  ;;  %v2986_v47 = vld [vmem:[%s5610_s1 + $0x4d8] sm:$0xf0] }
  0x9a   :  { %1527 = vmatpush.bf16.msra.mxu0 %v2573_v49  ;;  %v2509_v49 = vor.u32 %v3539_v39, %v2506_v40  ;;  %v2714_v52 = vld [vmem:[%s5610_s1 + $0x2b8] sm:$0xf0]  ;;  %v3623_v54 = vld [vmem:[%s5610_s1 + $0x3ac] sm:$0xf] }
  0x9b   :  { %1477 = vmatpush.bf16.msra.mxu1 %v2921_v58  ;;  %v2842_v56 = vld [vmem:[%s5610_s1 + $0x3b8] sm:$0xf0]  ;;  %v2989_v58 = vor.u32 %v3659_v46, %v2986_v47  ;;  %v3691_v59 = vld [vmem:[%s5610_s1 + $0x5cc] sm:$0xf] }
  0x9c   :  { %1515 = vmatpush.bf16.msrb.mxu2 %v2429_v53  ;;  %v3133_v53 = vor.u32 %v3695_v42, %v3130_v43  ;;  %v3114_v60 = vld [vmem:[%s5610_s1 + $0x5d8] sm:$0xf0]  ;;  %v3655_v62 = vld [vmem:[%s5610_s1 + $0x4ac] sm:$0xf] }
  0x9d   :  { %1490 = vmatpush.bf16.msra.mxu3 %v3049_v61  ;;  %v2717_v61 = vor.u32 %v3591_v50, %v2714_v52  ;;  %v2970_v63 = vld [vmem:[%s5610_s1 + $0x4b8] sm:$0xf0]  ;;  %v3587_v1 = vld [vmem:[%s5610_s1 + $0x28c] sm:$0xf] }
  0x9e   :  { %1528 = vmatpush.bf16.msra.mxu0 %v2557_v0  ;;  %v2845_v0 = vor.u32 %v3623_v54, %v2842_v56  ;;  %v2698_v2 = vld [vmem:[%s5610_s1 + $0x298] sm:$0xf0]  ;;  %v3619_v4 = vld [vmem:[%s5610_s1 + $0x38c] sm:$0xf] }
  0x9f   :  { %1478 = vmatpush.bf16.msra.mxu1 %v2905_v6  ;;  %v2826_v5 = vld [vmem:[%s5610_s1 + $0x398] sm:$0xf0]  ;;  %v2973_v6 = vor.u32 %v3655_v62, %v2970_v63  ;;  %v3687_v8 = vld [vmem:[%s5610_s1 + $0x5ac] sm:$0xf]  ;;  %v2701_v10 = vor.u32 %v3587_v1, %v2698_v2  ;;  %v3212_v1 = vld [vmem:[%s5612_s3 + $0x70] sm:$0xf] }
  0xa0   :  { %1516 = vmatpush.bf16.msrb.mxu2 %v2413_v3  ;;  %v3117_v3 = vor.u32 %v3691_v59, %v3114_v60  ;;  %v3098_v9 = vld [vmem:[%s5610_s1 + $0x5b8] sm:$0xf0]  ;;  %v2829_v12 = vor.u32 %v3619_v4, %v2826_v5  ;;  %v3583_v13 = vld [vmem:[%s5610_s1 + $0x26c] sm:$0xf] }
  0xa1   :  { %1491 = vmatpush.bf16.msra.mxu3 %v3033_v11  ;;  %v3651_v11 = vld [vmem:[%s5610_s1 + $0x48c] sm:$0xf]  ;;  %v2682_v14 = vld [vmem:[%s5610_s1 + $0x278] sm:$0xf0]  ;;  %v5031_v28 = vpop.f32.mrf.mxu1 }
  0xa2   :  { %1529 = vmatpush.bf16.msra.mxu0 %v2541_v15  ;;  %v3101_v15 = vor.u32 %v3687_v8, %v3098_v9  ;;  %v3615_v16 = vld [vmem:[%s5610_s1 + $0x36c] sm:$0xf]  ;;  %v3082_v20 = vld [vmem:[%s5610_s1 + $0x598] sm:$0xf0]  ;;  %v2685_v21 = vor.u32 %v3583_v13, %v2682_v14 }
  0xa3   :  { %1479 = vmatpush.bf16.msra.mxu1 %v2889_v23  ;;  %v3647_v22 = vld [vmem:[%s5610_s1 + $0x46c] sm:$0xf]  ;;  %v2938_v23 = vld [vmem:[%s5610_s1 + $0x478] sm:$0xf0] }
  0xa4   :  { %1517 = vmatpush.bf16.msrb.mxu2 %v2397_v19  ;;  %v5011_v17 = vpop.f32.mrf.mxu0  ;;  %v3683_v19 = vld [vmem:[%s5610_s1 + $0x58c] sm:$0xf]  ;;  %v3066_v34 = vld [vmem:[%s5610_s1 + $0x578] sm:$0xf0] }
  0xa5   :  { %1492 = vmatpush.bf16.msra.mxu3 %v3017_v26  ;;  %v3579_v25 = vld [vmem:[%s5610_s1 + $0x24c] sm:$0xf]  ;;  %v2666_v26 = vld [vmem:[%s5610_s1 + $0x258] sm:$0xf0] }
  0xa6   :  { %1530 = vmatpush.bf16.msra.mxu0 %v2525_v32  ;;  %1480 = vmatmul.bf16.vlgmr.msra.gmra.mxu1 %v4324_v30  ;;  %v3611_v29 = vld [vmem:[%s5610_s1 + $0x34c] sm:$0xf]  ;;  %v2941_v32 = vor.u32 %v3647_v22, %v2938_v23  ;;  %v2922_v39 = vld [vmem:[%s5610_s1 + $0x458] sm:$0xf0]  ;;  %v3204_v22 = vld [vmem:[%s5612_s3 + $0x60] sm:$0xf] }
  0xa7   :  { %1537 = vmatpush.bf16.msrb.mxu1 %v2749_v27  ;;  %v3085_v27 = vor.u32 %v3683_v19, %v3082_v20  ;;  %v3679_v33 = vld [vmem:[%s5610_s1 + $0x56c] sm:$0xf]  ;;  %v2650_v43 = vld [vmem:[%s5610_s1 + $0x238] sm:$0xf0]  ;;  %v3715_v23 = vld [vmem:[%s5612_s3 + $0x64] sm:$0xf0] }
  0xa8   :  { %1518 = vmatpush.bf16.msrb.mxu2 %v2381_v37  ;;  %1493 = vmatmul.bf16.vlgmr.msra.gmra.mxu3 %v4335_v35  ;;  %v2669_v37 = vor.u32 %v3579_v25, %v2666_v26  ;;  %v3643_v38 = vld [vmem:[%s5610_s1 + $0x44c] sm:$0xf]  ;;  %v2778_v47 = vld [vmem:[%s5610_s1 + $0x338] sm:$0xf0] }
  0xa9   :  { %1550 = vmatpush.bf16.msrb.mxu3 %v2877_v31  ;;  %v2794_v31 = vld [vmem:[%s5610_s1 + $0x358] sm:$0xf0]  ;;  %v5045_v36 = vpop.f32.mrf.mxu2  ;;  %v3575_v42 = vld [vmem:[%s5610_s1 + $0x22c] sm:$0xf]  ;;  %v1262_v4 = vpop.f32.mrf.mxu1 }
  0xaa   :  { %1531 = vmatpush.bf16.msra.mxu0 %v2509_v49  ;;  %v2797_v40 = vor.u32 %v3611_v29, %v2794_v31  ;;  %v3607_v46 = vld [vmem:[%s5610_s1 + $0x32c] sm:$0xf]  ;;  %v2925_v49 = vor.u32 %v3643_v38, %v2922_v39  ;;  %v3050_v52 = vld [vmem:[%s5610_s1 + $0x558] sm:$0xf0]  ;;  %v2653_v54 = vor.u32 %v3575_v42, %v2650_v43  ;;  %v3268_v29 = vld [vmem:[%s5612_s3 + $0xe0] sm:$0xf] }
  0xab   :  { %1538 = vmatpush.bf16.msrb.mxu1 %v2733_v44  ;;  %1519 = vmatmul.bf16.vlgmr.msrb.gmra.mxu2 %v4121_v55  ;;  %v2954_v55 = vld [vmem:[%s5610_s1 + $0x498] sm:$0xf0]  ;;  %v3069_v44 = vor.u32 %v3679_v33, %v3066_v34  ;;  %v3675_v50 = vld [vmem:[%s5610_s1 + $0x54c] sm:$0xf]  ;;  %v2781_v60 = vor.u32 %v3607_v46, %v2778_v47  ;;  %v3731_v31 = vld [vmem:[%s5612_s3 + $0xe4] sm:$0xf0] }
  0xac   :  { %1563 = vmatpush.bf16.msra.mxu2 %v3005_v41  ;;  %v2957_v18 = vor.u32 %v3651_v11, %v2954_v55  ;;  %v5053_v41 = vpop.f32.mrf.mxu3  ;;  %v3639_v56 = vld [vmem:[%s5610_s1 + $0x42c] sm:$0xf]  ;;  %v2762_v63 = vld [vmem:[%s5610_s1 + $0x318] sm:$0xf0]  ;;  %v3713_v34 = vld [vmem:[%s5612_s3 + $0x54] sm:$0xf0]  ;;  %v3269_v38 = vor.u32 %v3731_v31, %v3268_v29 }
  0xad   :  { %1551 = vmatpush.bf16.msrb.mxu3 %v2861_v48  ;;  %1532 = vmatmul.bf16.vlgmr.msra.gmra.mxu0 %v4154_v7  ;;  %v2810_v7 = vld [vmem:[%s5610_s1 + $0x378] sm:$0xf0]  ;;  %v1249_v48 = vpop.f32.mrf.mxu0  ;;  %v3571_v59 = vld [vmem:[%s5610_s1 + $0x20c] sm:$0xf]  ;;  %v3252_v46 = vld [vmem:[%s5612_s3 + $0xc0] sm:$0xf] }
  0xae   :  { %1576 = vmatpush.bf16.msrb.mxu0 %v3133_v53  ;;  %v2813_v24 = vor.u32 %v3615_v16, %v2810_v7  ;;  %v5076_v53 = vld [vmem:[%s5611_s2] sm:$0xf]  ;;  %v3603_v62 = vld [vmem:[%s5610_s1 + $0x30c] sm:$0xf]  ;;  %v3034_v9 = vld [vmem:[%s5610_s1 + $0x538] sm:$0xf0] }
  0xaf   :  { %1539 = vmatpush.bf16.msrb.mxu1 %v2717_v61  ;;  %v2634_v61 = vld [vmem:[%s5610_s1 + $0x218] sm:$0xf0]  ;;  %v3699_v2 = vld [vmem:[%s5610_s1 + $0x60c] sm:$0xf]  ;;  %v246_v13 = vperm.slane %v5076_v53, 0  ;;  %v2765_v14 = vor.u32 %v3603_v62, %v2762_v63 }
  0xb0   :  { %1564 = vmatpush.bf16.msra.mxu2 %v2989_v58  ;;  %v2906_v58 = vld [vmem:[%s5610_s1 + $0x438] sm:$0xf0]  ;;  %v3671_v8 = vld [vmem:[%s5610_s1 + $0x52c] sm:$0xf]  ;;  %v2637_v11 = vor.u32 %v3571_v59, %v2634_v61  ;;  %v3276_v7 = vld [vmem:[%s5612_s3 + $0xf0] sm:$0xf] }
  0xb1   :  { %1552 = vmatpush.bf16.msrb.mxu3 %v2845_v0  ;;  %v3053_v0 = vor.u32 %v3675_v50, %v3050_v52  ;;  %v2909_v5 = vor.u32 %v3639_v56, %v2906_v58  ;;  %v3635_v55 = vld [vmem:[%s5610_s1 + $0x40c] sm:$0xf]  ;;  %v3037_v20 = vor.u32 %v3671_v8, %v3034_v9  ;;  %v3018_v25 = vld [vmem:[%s5610_s1 + $0x518] sm:$0xf0]  ;;  %v3725_v58 = vld [vmem:[%s5612_s3 + $0xb4] sm:$0xf0] }
  0xb2   :  { %1577 = vmatpush.bf16.msrb.mxu0 %v3117_v3  ;;  %v3146_v3 = vld [vmem:[%s5610_s1 + $0x618] sm:$0xf0]  ;;  %v3172_v61 = vld [vmem:[%s5612_s3 + $0x20] sm:$0xf]  ;;  %v3707_v62 = vld [vmem:[%s5612_s3 + $0x24] sm:$0xf0] }
  0xb3   :  { %1540 = vmatpush.bf16.msrb.mxu1 %v2701_v10  ;;  %v1275_v10 = vpop.f32.mrf.mxu2  ;;  %v3236_v63 = vld [vmem:[%s5612_s3 + $0xa0] sm:$0xf]  ;;  %v3705_v4 = vld [vmem:[%s5612_s3 + $0x14] sm:$0xf0] }
  0xb4   :  { %1565 = vmatpush.bf16.msra.mxu2 %v2973_v6  ;;  %v3717_v6 = vld [vmem:[%s5612_s3 + $0x74] sm:$0xf0]  ;;  %v1288_v16 = vpop.f32.mrf.mxu3 }
  0xb5   :  { %1553 = vmatpush.bf16.msrb.mxu3 %v2829_v12  ;;  %v2890_v12 = vld [vmem:[%s5610_s1 + $0x418] sm:$0xf0]  ;;  %v3213_v19 = vor.u32 %v3717_v6, %v3212_v1  ;;  %v3173_v1 = vor.u32 %v3707_v62, %v3172_v61 }
  0xb6   :  { %1578 = vmatpush.bf16.msrb.mxu0 %v3101_v15  ;;  %v3149_v15 = vor.u32 %v3699_v2, %v3146_v3  ;;  %v3164_v3 = vld [vmem:[%s5612_s3 + $0x10] sm:$0xf]  ;;  %v3214_v16 = vld [vmem:[%s5612_s3 + $0x78] sm:$0xf0] }
  0xb7   :  { %1541 = vmatpush.bf16.msrb.mxu1 %v2685_v21  ;;  %v2893_v21 = vor.u32 %v3635_v55, %v2890_v12  ;;  %v3165_v55 = vor.u32 %v3705_v4, %v3164_v3  ;;  %v3745_v3 = vld [vmem:[%s5612_s3 + $0x154] sm:$0xf0]  ;;  %v3706_v4 = vld [vmem:[%s5612_s3 + $0x24] sm:$0xf] }
  0xb8   :  { %1566 = vmatpush.bf16.msra.mxu2 %v2957_v18  ;;  %v3733_v18 = vld [vmem:[%s5612_s3 + $0xf4] sm:$0xf0] }
  0xb9   :  { %1554 = vmatpush.bf16.msrb.mxu3 %v2813_v24  ;;  %v3667_v24 = vld [vmem:[%s5610_s1 + $0x50c] sm:$0xf]  ;;  %v3277_v26 = vor.u32 %v3733_v18, %v3276_v7  ;;  %v3220_v18 = vld [vmem:[%s5612_s3 + $0x80] sm:$0xf]  ;;  %s3819_s1 = smov [#allocation2]  }
  0xba   :  { %1579 = vmatpush.bf16.msrb.mxu0 %v3085_v27  ;;  %v1248_v27 = vadd.f32 %v5011_v17, %v246_v13  ;;  %v3021_v33 = vor.u32 %v3667_v24, %v3018_v25  ;;  %v3196_v17 = vld [vmem:[%s5612_s3 + $0x50] sm:$0xf]  ;;  %v3156_v13 = vld [vmem:[%s5612_s3] sm:$0xf] }
  0xbb   :  { %1542 = vmatpush.bf16.msrb.mxu1 %v2669_v37  ;;  %v1325_v37 = vpop.f32.mrf.mxu2  ;;  %v3197_v42 = vor.u32 %v3713_v34, %v3196_v17  ;;  %v3730_v17 = vld [vmem:[%s5612_s3 + $0xe4] sm:$0xf]  ;;  %v3270_v34 = vld [vmem:[%s5612_s3 + $0xe8] sm:$0xf0] }
  0xbc   :  { %1567 = vmatpush.bf16.msra.mxu2 %v2941_v32  ;;  %v3205_v32 = vor.u32 %v3715_v23, %v3204_v22  ;;  %v1261_v39 = vadd.f32 %v5031_v28, %v1248_v27  ;;  %v3711_v28 = vld [vmem:[%s5612_s3 + $0x44] sm:$0xf0]  ;;  %v3278_v22 = vld [vmem:[%s5612_s3 + $0xf8] sm:$0xf0]  ;;  %v3206_v27 = vld [vmem:[%s5612_s3 + $0x68] sm:$0xf0] }
  0xbd   :  { %1555 = vmatpush.bf16.msrb.mxu3 %v2797_v40  ;;  %v3729_v40 = vld [vmem:[%s5612_s3 + $0xd4] sm:$0xf0] }
  0xbe   :  { %1580 = vmatpush.bf16.msrb.mxu0 %v3069_v44  ;;  %v1274_v44 = vadd.f32 %v5045_v36, %v1261_v39  ;;  %v3709_v36 = vld [vmem:[%s5612_s3 + $0x34] sm:$0xf0]  ;;  %v3712_v39 = vld [vmem:[%s5612_s3 + $0x54] sm:$0xf] }
  0xbf   :  { %1543 = vmatpush.bf16.msrb.mxu1 %v2653_v54 }
  0xc0   :  { %1568 = vmatpush.bf16.msra.mxu2 %v2925_v49  ;;  %v1299_v48 = vpop.f32.mrf.mxu0  ;;  %v3180_v49 = vld [vmem:[%s5612_s3 + $0x30] sm:$0xf]  ;;  %v1287_v56 = vadd.f32 %v5053_v41, %v1274_v44  ;;  %v3749_v44 = vld [vmem:[%s5612_s3 + $0x174] sm:$0xf0] }
  0xc1   :  { %1556 = vmatpush.bf16.msrb.mxu3 %v2781_v60  ;;  %v3181_v59 = vor.u32 %v3709_v36, %v3180_v49 }
  0xc2   :  { %1581 = vmatpush.bf16.msrb.mxu0 %v3053_v0  ;;  %v1300_v60 = vadd.f32 %v1299_v48, %v1287_v56  ;;  %v3723_v0 = vld [vmem:[%s5612_s3 + $0xa4] sm:$0xf0]  ;;  %v3190_v48 = vld [vmem:[%s5612_s3 + $0x48] sm:$0xf0]  ;;  %v3708_v56 = vld [vmem:[%s5612_s3 + $0x34] sm:$0xf] }
  0xc3   :  { %1544 = vmatpush.bf16.msrb.mxu1 %v2637_v11  ;;  %v1312_v50 = vpop.f32.mrf.mxu1  ;;  %v1327_v52 = vpop.f32.mrf.mxu2  ;;  %v3237_v9 = vor.u32 %v3723_v0, %v3236_v63  ;;  %v3228_v11 = vld [vmem:[%s5612_s3 + $0x90] sm:$0xf]  ;;  %v3724_v63 = vld [vmem:[%s5612_s3 + $0xb4] sm:$0xf]  ;;  %v3246_v0 = vld [vmem:[%s5612_s3 + $0xb8] sm:$0xf0] }
  0xc4   :  { %1569 = vmatpush.bf16.msra.mxu2 %v2909_v5  ;;  %v1313_v2 = vadd.f32 %v1312_v50, %v1300_v60  ;;  %v3726_v50 = vld [vmem:[%s5612_s3 + $0xc4] sm:$0xf]  ;;  %v3254_v52 = vld [vmem:[%s5612_s3 + $0xc8] sm:$0xf0] }
  0xc5   :  { %1557 = vmatpush.bf16.msrb.mxu3 %v2765_v14  ;;  %v3703_v14 = vld [vmem:[%s5612_s3 + $0x4] sm:$0xf0]  ;;  %v3257_v61 = vor.u32 %v3726_v50, %v3254_v52 }
  0xc6   :  { %1582 = vmatpush.bf16.msrb.mxu0 %v3037_v20  ;;  %1545 = vmatmul.bf16.vlgmr.msrb.gmra.mxu1 %v4110_v51  ;;  %v3260_v51 = vld [vmem:[%s5612_s3 + $0xd0] sm:$0xf]  ;;  %v1326_v12 = vadd.f32 %v1325_v37, %v1313_v2  ;;  %v3157_v20 = vor.u32 %v3703_v14, %v3156_v13  ;;  %v3166_v13 = vld [vmem:[%s5612_s3 + $0x18] sm:$0xf0]  ;;  %v3316_v14 = vld [vmem:[%s5612_s3 + $0x140] sm:$0xf] }
  0xc7   :  { %1596 = vmatpush.bf16.msra.mxu1 %v3149_v15  ;;  %v3261_v43 = vor.u32 %v3729_v40, %v3260_v51  ;;  %v3716_v15 = vld [vmem:[%s5612_s3 + $0x74] sm:$0xf]  ;;  %v3198_v51 = vld [vmem:[%s5612_s3 + $0x58] sm:$0xf0]  ;;  %v3273_v40 = vor.u32 %v3730_v17, %v3270_v34  ;;  %v3324_v2 = vld [vmem:[%s5612_s3 + $0x150] sm:$0xf] }
  0xc8   :  { %1570 = vmatpush.bf16.msra.mxu2 %v2893_v21  ;;  %1558 = vmatmul.bf16.vlgmr.msrb.gmra.mxu3 %v4123_v57  ;;  %v3188_v57 = vld [vmem:[%s5612_s3 + $0x40] sm:$0xf]  ;;  %v1301_v5 = vpop.f32.mrf.mxu0  ;;  %v3732_v21 = vld [vmem:[%s5612_s3 + $0xf4] sm:$0xf]  ;;  %v1602_v23 = vmax.f32 %v1326_v12, 0.0  ;;  %v3217_v24 = vor.u32 %v3716_v15, %v3214_v16 }
  0xc9   :  { %2000 = vmatpush.bf16.msra.mxu3 %v3213_v19  ;;  %v3189_v47 = vor.u32 %v3711_v28, %v3188_v57  ;;  %v1338_v6 = vpop.f32.mrf.mxu3  ;;  %v3719_v19 = vld [vmem:[%s5612_s3 + $0x84] sm:$0xf0]  ;;  %v3728_v28 = vld [vmem:[%s5612_s3 + $0xd4] sm:$0xf]  ;;  %v3174_v5 = vld [vmem:[%s5612_s3 + $0x28] sm:$0xf0] }
  0xca   :  { %1583 = vmatpush.bf16.msrb.mxu0 %v3021_v33  ;;  %v3221_v29 = vor.u32 %v3719_v19, %v3220_v18  ;;  %v247_v33 = vperm.slane %v5076_v53, 1  ;;  %v5252_v37 = vpack.c.bf16 %v1602_v23, %v1602_v23  ;;  %v3704_v12 = vld [vmem:[%s5612_s3 + $0x14] sm:$0xf]  ;;  %v3743_v15 = vld [vmem:[%s5612_s3 + $0x144] sm:$0xf0] }
  0xcb   :  { %2013 = vmatpush.bf16.msrb.mxu1 %v3277_v26  ;;  %1571 = vmatmul.bf16.vlgmr.msra.gmra.mxu2 %v4324_v30  ;;  %v3727_v30 = vld [vmem:[%s5612_s3 + $0xc4] sm:$0xf0]  ;;  %v1314_v8 = vpop.f32.mrf.mxu1  ;;  %v3714_v26 = vld [vmem:[%s5612_s3 + $0x64] sm:$0xf]  ;;  %v3317_v19 = vor.u32 %v3743_v15, %v3316_v14  ;;  %v3230_v23 = vld [vmem:[%s5612_s3 + $0x98] sm:$0xf0] }
  0xcc   :  { %v3253_v54 = vor.u32 %v3727_v30, %v3252_v46  ;;  %v1339_v57 = vadd.f32 %v1338_v6, %v247_v33  ;;  %v3201_v46 = vor.u32 %v3712_v39, %v3198_v51  ;;  %v3325_v6 = vor.u32 %v3745_v3, %v3324_v2  ;;  %v3739_v33 = vld [vmem:[%s5612_s3 + $0x124] sm:$0xf0]  ;;  %v3718_v39 = vld [vmem:[%s5612_s3 + $0x84] sm:$0xf]  ;;  %v3222_v51 = vld [vmem:[%s5612_s3 + $0x88] sm:$0xf0] }
  0xcd   :  { %2001 = vmatpush.bf16.msra.mxu3 %v3205_v32  ;;  %1584 = vmatmul.bf16.vlgmr.msrb.gmra.mxu0 %v4335_v35  ;;  %v3244_v35 = vld [vmem:[%s5612_s3 + $0xb0] sm:$0xf]  ;;  %v3281_v32 = vor.u32 %v3732_v21, %v3278_v22  ;;  %v3720_v22 = vld [vmem:[%s5612_s3 + $0x94] sm:$0xf]  ;;  %v3735_v50 = vld [vmem:[%s5612_s3 + $0x104] sm:$0xf0] }
  0xce   :  { %v3245_v41 = vor.u32 %v3725_v58, %v3244_v35  ;;  %v1351_v10 = vpop.f32.mrf.mxu2  ;;  %v3182_v35 = vld [vmem:[%s5612_s3 + $0x38] sm:$0xf0]  ;;  %v3332_v58 = vld [vmem:[%s5612_s3 + $0x160] sm:$0xf]  ;;  %v3233_v34 = vor.u32 %v3720_v22, %v3230_v23  ;;  %v3740_v14 = vld [vmem:[%s5612_s3 + $0x134] sm:$0xf] }
  0xcf   :  { %2014 = vmatpush.bf16.msrb.mxu1 %v3269_v38  ;;  %v3209_v38 = vor.u32 %v3714_v26, %v3206_v27  ;;  %v1352_v36 = vadd.f32 %v1351_v10, %v1339_v57  ;;  %v3308_v26 = vld [vmem:[%s5612_s3 + $0x130] sm:$0xf]  ;;  %v3741_v27 = vld [vmem:[%s5612_s3 + $0x134] sm:$0xf0]  ;;  %v3326_v3 = vld [vmem:[%s5612_s3 + $0x158] sm:$0xf0] }
  0xd0   :  { %v3292_v57 = vld [vmem:[%s5612_s3 + $0x110] sm:$0xf]  ;;  %v3738_v23 = vld [vmem:[%s5612_s3 + $0x124] sm:$0xf] }
  0xd1   :  { %2002 = vmatpush.bf16.msra.mxu3 %v3197_v42  ;;  %v1340_v25 = vpop.f32.mrf.mxu3  ;;  %v3340_v42 = vld [vmem:[%s5612_s3 + $0x170] sm:$0xf] }
  0xd2   :  { %v3341_v30 = vor.u32 %v3749_v44, %v3340_v42  ;;  %v3702_v25 = vld [vmem:[%s5612_s3 + $0x4] sm:$0xf] }
  0xd3   :  { %2015 = vmatpush.bf16.msrb.mxu1 %v3261_v43  ;;  %v3262_v43 = vld [vmem:[%s5612_s3 + $0xd8] sm:$0xf0] }
  0xd4   :  { %v3265_v49 = vor.u32 %v3728_v28, %v3262_v43  ;;  %2026 = vmatpush.bf16.msrb.mxu2 %v3341_v30  ;;  %v3737_v28 = vld [vmem:[%s5612_s3 + $0x114] sm:$0xf0] }
  0xd5   :  { %2003 = vmatpush.bf16.msra.mxu3 %v3189_v47  ;;  %v3710_v47 = vld [vmem:[%s5612_s3 + $0x44] sm:$0xf] }
  0xd6   :  { %3153 = vmatmul.msk.bf16.vlgmr.msra.gmra.mxu1 %vm1234_vm0, %v4233_v45  ;;  %v3721_v45 = vld [vmem:[%s5612_s3 + $0x94] sm:$0xf0]  ;;  %v1353_v31 = vpop.f32.mrf.mxu2 }
  0xd7   :  { %2016 = vmatpush.bf16.msrb.mxu1 %v3253_v54  ;;  %v3229_v7 = vor.u32 %v3721_v45, %v3228_v11  ;;  %v3193_v54 = vor.u32 %v3710_v47, %v3190_v48  ;;  %v3722_v11 = vld [vmem:[%s5612_s3 + $0xa4] sm:$0xf]  ;;  %v3238_v45 = vld [vmem:[%s5612_s3 + $0xa8] sm:$0xf0]  ;;  %v3309_v31 = vor.u32 %v3741_v27, %v3308_v26  ;;  %v3293_v48 = vor.u32 %v3737_v28, %v3292_v57  ;;  %v3372_v26 = vld [vmem:[%s5612_s3 + $0x1b0] sm:$0xf] }
  0xd8   :  { %v3241_v18 = vor.u32 %v3722_v11, %v3238_v45  ;;  %v3318_v11 = vld [vmem:[%s5612_s3 + $0x148] sm:$0xf0]  ;;  %v3757_v27 = vld [vmem:[%s5612_s3 + $0x1b4] sm:$0xf0] }
  0xd9   :  { %2004 = vmatpush.bf16.msra.mxu3 %v3181_v59  ;;  %v3747_v59 = vld [vmem:[%s5612_s3 + $0x164] sm:$0xf0]  ;;  %v3286_v57 = vld [vmem:[%s5612_s3 + $0x108] sm:$0xf0] }
  0xda   :  { %v3333_v62 = vor.u32 %v3747_v59, %v3332_v58  ;;  %v3342_v58 = vld [vmem:[%s5612_s3 + $0x178] sm:$0xf0] }
  0xdb   :  { %2017 = vmatpush.bf16.msrb.mxu1 %v3245_v41 }
  0xdc   :  { %2027 = vmatpush.bf16.msrb.mxu2 %v3333_v62 }
  0xdd   :  { %2005 = vmatpush.bf16.msra.mxu3 %v3173_v1  ;;  %v3185_v1 = vor.u32 %v3708_v56, %v3182_v35  ;;  %v3748_v35 = vld [vmem:[%s5612_s3 + $0x174] sm:$0xf] }
  0xde   :  { %v3345_v59 = vor.u32 %v3748_v35, %v3342_v58  ;;  %v3764_v35 = vld [vmem:[%s5612_s3 + $0x1f4] sm:$0xf]  ;;  %v3406_v58 = vld [vmem:[%s5612_s3 + $0x1f8] sm:$0xf0] }
  0xdf   :  { %2018 = vmatpush.bf16.msrb.mxu1 %v3237_v9  ;;  %v3249_v9 = vor.u32 %v3724_v63, %v3246_v0  ;;  %v3765_v63 = vld [vmem:[%s5612_s3 + $0x1f4] sm:$0xf0]  ;;  %v3744_v0 = vld [vmem:[%s5612_s3 + $0x154] sm:$0xf] }
  0xe0   :  { %v1364_v60 = vpop.f32.mrf.mxu0  ;;  %2028 = vmatpush.bf16.msrb.mxu2 %v3325_v6  ;;  %v3763_v6 = vld [vmem:[%s5612_s3 + $0x1e4] sm:$0xf0] }
  0xe1   :  { %2006 = vmatpush.bf16.msra.mxu3 %v3165_v55  ;;  %v1365_v41 = vadd.f32 %v1364_v60, %v1352_v36  ;;  %v3177_v55 = vor.u32 %v3706_v4, %v3174_v5  ;;  %v3284_v36 = vld [vmem:[%s5612_s3 + $0x100] sm:$0xf]  ;;  %v3746_v60 = vld [vmem:[%s5612_s3 + $0x164] sm:$0xf]  ;;  %v3329_v4 = vor.u32 %v3744_v0, %v3326_v3 }
  0xe2   :  { %v3396_v5 = vld [vmem:[%s5612_s3 + $0x1e0] sm:$0xf] }
  0xe3   :  { %2019 = vmatpush.bf16.msrb.mxu1 %v3229_v7 }
  0xe4   :  { %2029 = vmatpush.bf16.msrb.mxu2 %v3317_v19 }
  0xe5   :  { %2007 = vmatpush.bf16.msra.mxu3 %v3157_v20 }
  0xe7   :  { %2020 = vmatpush.bf16.msrb.mxu1 %v3221_v29  ;;  %v3158_v29 = vld [vmem:[%s5612_s3 + $0x8] sm:$0xf0] }
  0xe8   :  { %2008 = vmatmul.bf16.vlgmr.msra.gmra.mxu3 %v5252_v37  ;;  %v1366_v16 = vpop.f32.mrf.mxu0  ;;  %2030 = vmatpush.bf16.msrb.mxu2 %v3309_v31  ;;  %v3736_v31 = vld [vmem:[%s5612_s3 + $0x114] sm:$0xf] }
  0xe9   :  { %2052 = vmatpush.bf16.msrb.mxu3 %v3217_v24  ;;  %v1390_v7 = vpop.f32.mrf.mxu3  ;;  %v3169_v24 = vor.u32 %v3704_v12, %v3166_v13  ;;  %v3388_v12 = vld [vmem:[%s5612_s3 + $0x1d0] sm:$0xf]  ;;  %v3761_v13 = vld [vmem:[%s5612_s3 + $0x1d4] sm:$0xf0] }
  0xeb   :  { %2065 = vmatpush.bf16.msra.mxu1 %v3281_v32  ;;  %v1377_v8 = vpop.f32.mrf.mxu1  ;;  %v3300_v32 = vld [vmem:[%s5612_s3 + $0x120] sm:$0xf] }
  0xec   :  { %v1378_v10 = vadd.f32 %v1377_v8, %v1365_v41  ;;  %v3301_v42 = vor.u32 %v3739_v33, %v3300_v32  ;;  %v3404_v41 = vld [vmem:[%s5612_s3 + $0x1f0] sm:$0xf]  ;;  %v3742_v8 = vld [vmem:[%s5612_s3 + $0x144] sm:$0xf]  ;;  %v3294_v32 = vld [vmem:[%s5612_s3 + $0x118] sm:$0xf0] }
  0xed   :  { %2053 = vmatpush.bf16.msrb.mxu3 %v3209_v38  ;;  %v3405_v2 = vor.u32 %v3765_v63, %v3404_v41  ;;  %v3321_v45 = vor.u32 %v3742_v8, %v3318_v11  ;;  %v248_v33 = vperm.slane %v5076_v53, 2  ;;  %v3762_v41 = vld [vmem:[%s5612_s3 + $0x1e4] sm:$0xf]  ;;  %v3398_v63 = vld [vmem:[%s5612_s3 + $0x1e8] sm:$0xf0] }
  0xee   :  { %v1391_v20 = vadd.f32 %v1390_v7, %v1378_v10  ;;  %2031 = vmatpush.bf16.msrb.mxu2 %v3301_v42  ;;  %v3397_v10 = vor.u32 %v3763_v6, %v3396_v5  ;;  %v3389_v7 = vor.u32 %v3761_v13, %v3388_v12  ;;  %v3734_v42 = vld [vmem:[%s5612_s3 + $0x104] sm:$0xf]  ;;  %v3760_v5 = vld [vmem:[%s5612_s3 + $0x1d4] sm:$0xf]  ;;  %v3390_v6 = vld [vmem:[%s5612_s3 + $0x1d8] sm:$0xf0] }
  0xef   :  { %2066 = vmatpush.bf16.msra.mxu1 %v3273_v40  ;;  %v3161_v40 = vor.u32 %v3702_v25, %v3158_v29  ;;  %2039 = vmatpush.bf16.msra.mxu0 %v3405_v2  ;;  %v3401_v2 = vor.u32 %v3762_v41, %v3398_v63  ;;  %v3382_v12 = vld [vmem:[%s5612_s3 + $0x1c8] sm:$0xf0]  ;;  %v3773_v63 = vld [vmem:[%s5614_s5 + $0x38] sm:$0xff] }
  0xf0   :  { %v1403_v21 = vpop.f32.mrf.mxu2  ;;  %v1416_v43 = vpop.f32.mrf.mxu0 }
  0xf1   :  { %2054 = vmatpush.bf16.msrb.mxu3 %v3201_v46  ;;  %v1404_v38 = vadd.f32 %v1403_v21, %v1391_v20  ;;  %v1392_v44 = vpop.f32.mrf.mxu3  ;;  %v3225_v46 = vor.u32 %v3718_v39, %v3222_v51  ;;  %v3380_v20 = vld [vmem:[%s5612_s3 + $0x1c0] sm:$0xf]  ;;  %v3759_v21 = vld [vmem:[%s5612_s3 + $0x1c4] sm:$0xf0] }
  0xf2   :  { %2032 = vmatpush.bf16.msrb.mxu2 %v3293_v48  ;;  %v3381_v22 = vor.u32 %v3759_v21, %v3380_v20  ;;  %v3364_v39 = vld [vmem:[%s5612_s3 + $0x1a0] sm:$0xf]  ;;  %v3755_v51 = vld [vmem:[%s5612_s3 + $0x1a4] sm:$0xf0]  ;;  %v3289_v44 = vor.u32 %v3734_v42, %v3286_v57  ;;  %v3753_v48 = vld [vmem:[%s5612_s3 + $0x194] sm:$0xf0] }
  0xf3   :  { %2067 = vmatpush.bf16.msra.mxu1 %v3265_v49  ;;  %v1379_v17 = vpop.f32.mrf.mxu1  ;;  %v1417_v30 = vadd.f32 %v1416_v43, %v1404_v38  ;;  %2040 = vmatpush.bf16.msra.mxu0 %v3397_v10  ;;  %v3297_v38 = vor.u32 %v3736_v31, %v3294_v32  ;;  %v3365_v43 = vor.u32 %v3755_v51, %v3364_v39  ;;  %v249_v21 = vperm.slane %v5076_v53, 3  ;;  %v3350_v53 = vld [vmem:[%s5612_s3 + $0x188] sm:$0xf0] }
  0xf4   :  { %v3373_v17 = vor.u32 %v3757_v27, %v3372_v26 }
  0xf5   :  { %2055 = vmatpush.bf16.msrb.mxu3 %v3193_v54  ;;  %v1603_v49 = vmax.f32 %v1417_v30, 0.0  ;;  %v3285_v54 = vor.u32 %v3735_v50, %v3284_v36 }
  0xf7   :  { %2068 = vmatpush.bf16.msra.mxu1 %v3257_v61  ;;  %v1607_v52 = vpack.c.bf16 %v1603_v49, %v1603_v49  ;;  %2033 = vmatpush.bf16.msrb.mxu2 %v3285_v54  ;;  %v3751_v54 = vld [vmem:[%s5612_s3 + $0x184] sm:$0xf0] }
  0xf8   :  { %v1405_v47 = vpop.f32.mrf.mxu2  ;;  %v1418_v56 = vpop.f32.mrf.mxu0  ;;  %2041 = vmatpush.bf16.msra.mxu0 %v3389_v7 }
  0xf9   :  { %2056 = vmatpush.bf16.msrb.mxu3 %v3185_v1  ;;  %2021 = vmatmul.bf16.vlgmr.msrb.gmra.mxu1 %v1607_v52  ;;  %v3356_v47 = vld [vmem:[%s5612_s3 + $0x190] sm:$0xf] }
  0xfa   :  { %v3357_v49 = vor.u32 %v3753_v48, %v3356_v47 }
  0xfb   :  { %2069 = vmatpush.bf16.msra.mxu1 %v3249_v9  ;;  %2078 = vmatpush.bf16.msra.mxu2 %v3345_v59 }
  0xfc   :  { %2042 = vmatpush.bf16.msra.mxu0 %v3381_v22  ;;  %v3752_v22 = vld [vmem:[%s5612_s3 + $0x194] sm:$0xf] }
  0xfd   :  { %2057 = vmatpush.bf16.msrb.mxu3 %v3177_v55 }
  0xff   :  { %2070 = vmatpush.bf16.msra.mxu1 %v3241_v18  ;;  %v3310_v18 = vld [vmem:[%s5612_s3 + $0x138] sm:$0xf0] }
 0x100   :  { %v3313_v19 = vor.u32 %v3740_v14, %v3310_v18  ;;  %2043 = vmatpush.bf16.msra.mxu0 %v3373_v17  ;;  %v3754_v18 = vld [vmem:[%s5612_s3 + $0x1a4] sm:$0xf] }
 0x101   :  { %2058 = vmatpush.bf16.msrb.mxu3 %v3169_v24  ;;  %v3302_v24 = vld [vmem:[%s5612_s3 + $0x128] sm:$0xf0] }
 0x102   :  { %v3305_v25 = vor.u32 %v3738_v23, %v3302_v24  ;;  %v3358_v23 = vld [vmem:[%s5612_s3 + $0x198] sm:$0xf0] }
 0x103   :  { %2071 = vmatpush.bf16.msra.mxu1 %v3233_v34  ;;  %v1429_v1 = vpop.f32.mrf.mxu1  ;;  %v3361_v24 = vor.u32 %v3752_v22, %v3358_v23 }
 0x104   :  { %v1430_v28 = vadd.f32 %v1429_v1, %v248_v33  ;;  %2044 = vmatpush.bf16.msra.mxu0 %v3365_v43 }
 0x105   :  { %2059 = vmatpush.bf16.msrb.mxu3 %v3161_v40 }
 0x106   :  { %v5388_v62 = vpop.f32.mrf.mxu0 }
 0x107   :  { %2072 = vmatpush.bf16.msra.mxu1 %v3225_v46 }
 0x108   :  { %2060 = vmatmul.bf16.vlgmr.msrb.gmra.mxu3 %v5252_v37  ;;  %v3334_v37 = vld [vmem:[%s5612_s3 + $0x168] sm:$0xf0]  ;;  %2045 = vmatpush.bf16.msra.mxu0 %v3357_v49 }
 0x109   :  { %v3337_v61 = vor.u32 %v3746_v60, %v3334_v37  ;;  %v3409_v60 = vor.u32 %v3764_v35, %v3406_v58  ;;  %2240 = vmatpush.bf16.msra.mxu3 %v3773_v63 }
 0x10a   :  { %2073 = vmatmul.bf16.vlgmr.msra.gmra.mxu1 %v1607_v52  ;;  %v3348_v52 = vld [vmem:[%s5612_s3 + $0x180] sm:$0xf] }
 0x10b   :  { %2079 = vmatpush.bf16.msra.mxu2 %v3337_v61  ;;  %v1442_v9 = vpop.f32.mrf.mxu3  ;;  %v1431_v16 = vpop.f32.mrf.mxu1  ;;  %v3349_v56 = vor.u32 %v3751_v54, %v3348_v52 }
 0x10c   :  { %v1443_v46 = vadd.f32 %v1442_v9, %v1430_v28  ;;  %v3393_v9 = vor.u32 %v3760_v5, %v3390_v6  ;;  %v3374_v16 = vld [vmem:[%s5612_s3 + $0x1b8] sm:$0xf0]  ;;  %v3768_v5 = vld [vmem:[%s5614_s5 + $0x10] sm:$0xff] }
 0x10d   :  { %2046 = vmatpush.bf16.msra.mxu0 %v3349_v56  ;;  %v3780_v6 = vld [vmem:[%s5614_s5 + $0x70] sm:$0xff] }
 0x10e   :  { %v1457_v55 = vpop.f32.mrf.mxu0  ;;  %v1468_v15 = vpop.f32.mrf.mxu2  ;;  %v1456_v36 = vadd.f32 %v5388_v62, %v1443_v46 }
 0x10f   :  { %2080 = vmatpush.bf16.msra.mxu2 %v3329_v4  ;;  %v3758_v55 = vld [vmem:[%s5612_s3 + $0x1c4] sm:$0xf] }
 0x110   :  { %v1469_v59 = vadd.f32 %v1468_v15, %v1456_v36  ;;  %v3385_v13 = vor.u32 %v3758_v55, %v3382_v12  ;;  %v3756_v15 = vld [vmem:[%s5612_s3 + $0x1b4] sm:$0xf]  ;;  %v1674_v36 = vld [vmem:[%s5613_s4] sm:$0x3]  ;;  %v3777_v55 = vld [vmem:[%s5614_s5 + $0x58] sm:$0xff] }
 0x111   :  { %2091 = vmatpush.bf16.msrb.mxu0 %v3409_v60  ;;  %v3377_v7 = vor.u32 %v3756_v15, %v3374_v16  ;;  %v3776_v12 = vld [vmem:[%s5614_s5 + $0x50] sm:$0xff]  ;;  %v3774_v16 = vld [vmem:[%s5614_s5 + $0x40] sm:$0xff] }
 0x113   :  { %2081 = vmatpush.bf16.msra.mxu2 %v3321_v45  ;;  %v1444_v29 = vpop.f32.mrf.mxu3 }
 0x114   :  { %v3750_v29 = vld [vmem:[%s5612_s3 + $0x184] sm:$0xf] }
 0x115   :  { %2092 = vmatpush.bf16.msrb.mxu0 %v3401_v2  ;;  %v3353_v31 = vor.u32 %v3750_v29, %v3350_v53  ;;  %v3770_v2 = vld [vmem:[%s5614_s5 + $0x20] sm:$0xff] }
 0x116   :  { %v1507_v34 = vpop.f32.mrf.mxu0  ;;  %v1470_v40 = vpop.f32.mrf.mxu2 }
 0x117   :  { %2082 = vmatpush.bf16.msra.mxu2 %v3313_v19  ;;  %v3366_v19 = vld [vmem:[%s5612_s3 + $0x1a8] sm:$0xf0] }
 0x118   :  { %v3369_v20 = vor.u32 %v3754_v18, %v3366_v19  ;;  %v3788_v19 = vld [vmem:[%s5616_s7 + $0x30] sm:$0xff] }
 0x119   :  { %2093 = vmatpush.bf16.msrb.mxu0 %v3393_v9  ;;  %v3779_v9 = vld [vmem:[%s5614_s5 + $0x68] sm:$0xff] }
 0x11b   :  { %2083 = vmatpush.bf16.msra.mxu2 %v3305_v25 }
 0x11d   :  { %2094 = vmatpush.bf16.msrb.mxu0 %v3385_v13 }
 0x11e   :  { %v1509_v30 = vpop.f32.mrf.mxu0 }
 0x11f   :  { %2084 = vmatpush.bf16.msra.mxu2 %v3297_v38 }
 0x121   :  { %2095 = vmatpush.bf16.msrb.mxu0 %v3377_v7  ;;  %v3789_v7 = vld [vmem:[%s5616_s7 + $0x38] sm:$0xff] }
 0x123   :  { %2085 = vmatpush.bf16.msra.mxu2 %v3289_v44  ;;  %v1481_v50 = vpop.f32.mrf.mxu1 }
 0x124   :  { %v1482_v37 = vadd.f32 %v1481_v50, %v1469_v59  ;;  %v1676_v50 = vperm.slane %v1674_v36, 0  ;;  %v1677_v59 = vperm.slane %v1674_v36, 1 }
 0x125   :  { %2096 = vmatpush.bf16.msrb.mxu0 %v3369_v20  ;;  %v3787_v20 = vld [vmem:[%s5616_s7 + $0x28] sm:$0xff] }
 0x129   :  { %2097 = vmatpush.bf16.msrb.mxu0 %v3361_v24  ;;  %v3786_v24 = vld [vmem:[%s5616_s7 + $0x20] sm:$0xff] }
 0x12a   :  { %v1533_v61 = vpop.f32.mrf.mxu0 }
 0x12b   :  { %v1494_v62 = vpop.f32.mrf.mxu3  ;;  %v1483_v1 = vpop.f32.mrf.mxu1 }
 0x12c   :  { %v1495_v0 = vadd.f32 %v1494_v62, %v1482_v37  ;;  %v3771_v1 = vld [vmem:[%s5614_s5 + $0x28] sm:$0xff] }
 0x12d   :  { %2098 = vmatpush.bf16.msrb.mxu0 %v3353_v31 }
 0x12e   :  { %v1508_v3 = vadd.f32 %v1507_v34, %v1495_v0  ;;  %v1520_v4 = vpop.f32.mrf.mxu2  ;;  %v3772_v0 = vld [vmem:[%s5614_s5 + $0x30] sm:$0xff] }
 0x12f   :  { %v1521_v25 = vadd.f32 %v1520_v4, %v249_v21  ;;  %2241 = vmatpush.bf16.msra.mxu3 %v3772_v0  ;;  %v3769_v4 = vld [vmem:[%s5614_s5 + $0x18] sm:$0xff] }
 0x130   :  { %v1604_v8 = vmax.f32 %v1508_v3, 0.0  ;;  %v3781_v3 = vld [vmem:[%s5614_s5 + $0x78] sm:$0xff] }
 0x131   :  { %v1534_v27 = vadd.f32 %v1533_v61, %v1521_v25  ;;  %2253 = vmatpush.bf16.msrb.mxu1 %v3781_v3 }
 0x132   :  { %v1608_v10 = vpack.c.bf16 %v1604_v8, %v1604_v8  ;;  %v1535_v11 = vpop.f32.mrf.mxu0  ;;  %v3767_v8 = vld [vmem:[%s5614_s5 + $0x8] sm:$0xff] }
 0x133   :  { %v1496_v45 = vpop.f32.mrf.mxu3  ;;  %2242 = vmatpush.bf16.msra.mxu3 %v3771_v1  ;;  %v3766_v11 = vld [vmem:[%s5614_s5] sm:$0xff] }
 0x134   :  { %2034 = vmatmul.bf16.vlgmr.msrb.gmra.mxu2 %v1608_v10  ;;  %v3778_v45 = vld [vmem:[%s5614_s5 + $0x60] sm:$0xff] }
 0x135   :  { %2254 = vmatpush.bf16.msrb.mxu1 %v3780_v6  ;;  %2336 = vmatpush.bf16.msrb.mxu2 %v3789_v7 }
 0x136   :  { %v1522_v14 = vpop.f32.mrf.mxu2 }
 0x137   :  { %2243 = vmatpush.bf16.msra.mxu3 %v3770_v2  ;;  %v3775_v14 = vld [vmem:[%s5614_s5 + $0x48] sm:$0xff] }
 0x139   :  { %2255 = vmatpush.bf16.msrb.mxu1 %v3779_v9  ;;  %2337 = vmatpush.bf16.msrb.mxu2 %v3788_v19 }
 0x13b   :  { %2244 = vmatpush.bf16.msra.mxu3 %v3769_v4 }
 0x13d   :  { %2256 = vmatpush.bf16.msrb.mxu1 %v3778_v45  ;;  %2338 = vmatpush.bf16.msrb.mxu2 %v3787_v20 }
 0x13f   :  { %2245 = vmatpush.bf16.msra.mxu3 %v3768_v5 }
 0x141   :  { %2257 = vmatpush.bf16.msrb.mxu1 %v3777_v55  ;;  %2339 = vmatpush.bf16.msrb.mxu2 %v3786_v24 }
 0x143   :  { %v1546_v26 = vpop.f32.mrf.mxu1  ;;  %2246 = vmatpush.bf16.msra.mxu3 %v3767_v8 }
 0x144   :  { %2086 = vmatmul.bf16.vlgmr.msra.gmra.mxu2 %v1608_v10  ;;  %v1547_v32 = vadd.f32 %v1546_v26, %v1534_v27 }
 0x145   :  { %2258 = vmatpush.bf16.msrb.mxu1 %v3776_v12 }
 0x147   :  { %2247 = vmatpush.bf16.msra.mxu3 %v3766_v11 }
 0x149   :  { %2259 = vmatpush.bf16.msrb.mxu1 %v3775_v14 }
 0x14a   :  { %v1585_v17 = vpop.f32.mrf.mxu0 }
 0x14b   :  { %v1559_v33 = vpop.f32.mrf.mxu3  ;;  %v1548_v38 = vpop.f32.mrf.mxu1 }
 0x14c   :  { %v1560_v34 = vadd.f32 %v1559_v33, %v1547_v32  ;;  %v3784_v38 = vld [vmem:[%s5616_s7 + $0x10] sm:$0xff] }
 0x14d   :  { %2260 = vmatpush.bf16.msrb.mxu1 %v3774_v16 }
 0x14e   :  { %v1572_v39 = vpop.f32.mrf.mxu2 }
 0x14f   :  { %v1573_v51 = vadd.f32 %v1572_v39, %v1560_v34  ;;  %v3785_v34 = vld [vmem:[%s5616_s7 + $0x18] sm:$0xff]  ;;  %v3783_v39 = vld [vmem:[%s5616_s7 + $0x8] sm:$0xff] }
 0x150   :  { %2340 = vmatpush.bf16.msrb.mxu2 %v3785_v34 }
 0x151   :  { %v1586_v57 = vadd.f32 %v1585_v17, %v1573_v51  ;;  %v3782_v51 = vld [vmem:[%s5616_s7] sm:$0xff]  ;;  %s2355_s7 = sshll.u32 %s3819_s1, 4  ;;  %s2356_s7 = int_to_ptr.vmem [resolvable:$true] %s2355_s7 }
 0x152   :  { %v1587_v42 = vpop.f32.mrf.mxu0 }
 0x153   :  { %v1561_v40 = vpop.f32.mrf.mxu3  ;;  %v1598_v28 = vpop.f32.mrf.mxu1  ;;  %v3791_v42 = vld [vmem:[%s5615_s6] ss:$0 sm:$0xff] }
 0x154   :  { %v1599_v43 = vadd.f32 %v1598_v28, %v1586_v57  ;;  %2341 = vmatpush.bf16.msrb.mxu2 %v3784_v38 }
 0x156   :  { %v1574_v44 = vpop.f32.mrf.mxu2  ;;  %v1605_v46 = vmax.f32 %v1599_v43, 0.0 }
 0x158   :  { %v1609_v30 = vpack.c.bf16 %v1605_v46, %v1605_v46  ;;  %2342 = vmatpush.bf16.msrb.mxu2 %v3783_v39 }
 0x15a   :  { %2047 = vmatmul.bf16.vlgmr.msra.gmra.mxu0 %v1609_v30 }
 0x15b   :  { %v1600_v47 = vpop.f32.mrf.mxu1 }
 0x15c   :  { %2343 = vmatpush.bf16.msrb.mxu2 %v3782_v51 }
 0x16a   :  { %2099 = vmatmul.bf16.vlgmr.msrb.gmra.mxu0 %v1609_v30 }
 0x16b   :  { %v2009_v48 = vpop.f32.mrf.mxu3 }
 0x16c   :  { %v2010_v52 = vadd.f32 %v2009_v48, %v1676_v50  ;;  %v3792_v48 = vld [vmem:[%s5617_s8] ss:$0 sm:$0xff] }
 0x173   :  { %v2011_v49 = vpop.f32.mrf.mxu3 }
 0x176   :  { %v2022_v54 = vpop.f32.mrf.mxu1 }
 0x177   :  { %v2023_v56 = vadd.f32 %v2022_v54, %v2010_v52 }
 0x17e   :  { %v2024_v58 = vpop.f32.mrf.mxu1 }
 0x187   :  { %v2074_v61 = vpop.f32.mrf.mxu1 }
 0x18b   :  { %v2061_v35 = vpop.f32.mrf.mxu3 }
 0x18c   :  { %v2062_v37 = vadd.f32 %v2061_v35, %v1677_v59 }
 0x18e   :  { %v2075_v62 = vadd.f32 %v2074_v61, %v2062_v37 }
 0x18f   :  { %v2076_v41 = vpop.f32.mrf.mxu1 }
 0x193   :  { %v2063_v60 = vpop.f32.mrf.mxu3 }
 0x1b7   :  { %v2035_v10 = vpop.f32.mrf.mxu2 }
 0x1b8   :  { %v2036_v21 = vadd.f32 %v2035_v10, %v2023_v56 }
 0x1bf   :  { %v2037_v13 = vpop.f32.mrf.mxu2 }
 0x1c7   :  { %v2087_v15 = vpop.f32.mrf.mxu2 }
 0x1c8   :  { %v2088_v29 = vadd.f32 %v2087_v15, %v2075_v62 }
 0x1cf   :  { %v2089_v18 = vpop.f32.mrf.mxu2 }
 0x1d7   :  { %v2048_v22 = vpop.f32.mrf.mxu0 }
 0x1d8   :  { %v2049_v23 = vadd.f32 %v2048_v22, %v2036_v21 }
 0x1da   :  { %v2104_v25 = vmax.f32 %v2049_v23, 0.0 }
 0x1dc   :  { %v2106_v26 = vpack.c.bf16 %v2104_v25, %v2104_v25 }
 0x1de   :  { %2248 = vmatmul.bf16.vlgmr.msra.gmra.mxu3 %v2106_v26 }
 0x1df   :  { %v2050_v27 = vpop.f32.mrf.mxu0 }
 0x1e7   :  { %v2100_v53 = vpop.f32.mrf.mxu0 }
 0x1e8   :  { %v2101_v31 = vadd.f32 %v2100_v53, %v2088_v29 }
 0x1ea   :  { %v2105_v32 = vmax.f32 %v2101_v31, 0.0 }
 0x1ec   :  { %v2107_v33 = vpack.c.bf16 %v2105_v32, %v2105_v32 }
 0x1ee   :  { %2261 = vmatmul.bf16.vlgmr.msrb.gmra.mxu1 %v2107_v33 }
 0x1ef   :  { %v2102_v17 = vpop.f32.mrf.mxu0 }
 0x261   :  { %v2249_v40 = vpop.f32.mrf.mxu3 }
 0x262   :  { %v2250_v28 = vadd.f32 %v3791_v42, %v2249_v40 }
 0x269   :  { %v2251_v57 = vpop.f32.mrf.mxu3 }
 0x26b   :  { %v2262_v43 = vpop.f32.mrf.mxu1 }
 0x26c   :  { %v2263_v44 = vadd.f32 %v2262_v43, %v2250_v28 }
 0x26e   :  { %v2266_v46 = vmax.f32 %v2263_v44, 0.0 }
 0x270   :  { %v2267_v30 = vpack.c.bf16 %v2266_v46, %v2266_v46 }
 0x272   :  { %2344 = vmatmul.bf16.vlgmr.msrb.gmra.mxu2 %v2267_v30 }
 0x273   :  { %v2264_v47 = vpop.f32.mrf.mxu1 }
 0x2f5   :  { %v2345_v49 = vpop.f32.mrf.mxu2 }
 0x2f6   :  { %v2346_v36 = vadd.f32 %v3792_v48, %v2345_v49 }
 0x2f8   :  { %2349 = vst [vmem:[#allocation2] sm:$0xff] %v2346_v36 }
 0x2f9   :  { %2360 = dma.vmem_to_hbm [thread:$0]  %s2356_s7, 128, %s2358_s24, [#allocation3]  }
 0x2fd   :  { %v2347_v50 = vpop.f32.mrf.mxu2 }
 0x2fe   :  { %3817 = dma.done.wait [#allocation3], 128  }
 0x2ff   :  { %3818 = vsyncadd [#allocation3], 4294967168 }
 0x300   :  { %2365 = vsyncpa [#allocation3], 1 }

</bundles_post_ra>
